<compile_context>
chip_gen: v5e
topology: v5e:2x2
jax: 0.10.0
libtpu: 0.0.40
codegen_flags: <defaults>
</compile_context>

<pallas_src>
import functools
from collections import namedtuple

import jax
import jax.numpy as jnp
from jax.experimental import pallas as pl
from jax.experimental.pallas import tpu as pltpu

LossTuple = namedtuple(
    "LossTuple",
    ["rpn_loc_loss", "rpn_cls_loss", "roi_loc_loss", "roi_cls_loss", "total_loss"],
)

# hyper-params (opt.rpn_sigma / opt.roi_sigma in the reference repo)
RPN_SIGMA = 3.0
ROI_SIGMA = 1.0
N_FG_CLASS = 20
N_CLASS = N_FG_CLASS + 1            # 21 (background included)
N_ANCHOR = 4                        # anchors per feature-map location
N_SAMPLE_ROI = 128                  # ProposalTargetCreator sample count
FEAT_CH = 32                        # extractor output channels

RPN_LOC_W = 4 * N_ANCHOR            # 16 lanes: rpn loc (anchor*4 + coord)
RPN_OUT_USED = RPN_LOC_W + N_ANCHOR  # 20 lanes: + per-anchor score diff
RPN_OUT_PAD = 32                    # padded fused-RPN output width
HEAD_LOC_W = 4 * N_CLASS            # 84 lanes: roi cls_loc
HEAD_USED = HEAD_LOC_W + N_CLASS    # 105 lanes: + roi score
HEAD_PAD = 128                      # lane-dense padded head output width


# ----------------------------------------------------------------------------
# Kernel 1: fused extractor + RPN + RPN losses (in-kernel accumulator)
# ----------------------------------------------------------------------------
def _rpn_fused_kernel(x_ref, wext_ref, bext_ref, wrpn_ref, brpn_ref,
                      wout_ref, bout_ref, gt_ref, lab_ref, acc_ref, *, sigma):
    f32 = jnp.float32

    # Output block is revisited across the whole grid -> VMEM-resident
    # accumulator; zero it on the first tile.
    @pl.when(pl.program_id(0) == 0)
    def _():
        acc_ref[...] = jnp.zeros_like(acc_ref)

    # --- fused matmul chain, all intermediates VMEM-resident ---
    feat = jnp.dot(x_ref[...], wext_ref[...], preferred_element_type=f32)
    feat = jnp.maximum(feat + bext_ref[...], 0.0)                       # (T, 32)
    mid = jnp.dot(feat, wrpn_ref[...], preferred_element_type=f32)
    mid = jnp.maximum(mid + brpn_ref[...], 0.0)                         # (T, 32)
    out = jnp.dot(mid, wout_ref[...], preferred_element_type=f32) + bout_ref[...]
    # out lanes: [0:16] rpn_loc (anchor*4+coord), [16:20] per-anchor logit diff

    lane = jax.lax.broadcasted_iota(jnp.int32, out.shape, 1)
    lab = lab_ref[...]                                                  # (T, 32) int32
    gt = gt_ref[...]                                                    # (T, 32) f32
    loc_lane = lane < RPN_LOC_W
    ce_lane = (lane >= RPN_LOC_W) & (lane < RPN_OUT_USED)

    # --- _fast_rcnn_loc_loss (smooth L1, in_weight = label>0) partial sums ---
    sigma2 = sigma * sigma
    diff = jnp.where((lab > 0) & loc_lane, out - gt, 0.0)
    ad = jnp.abs(diff)
    y = jnp.where(ad < (1.0 / sigma2), 0.5 * sigma2 * diff * diff, ad - 0.5 / sigma2)
    loc_sum = jnp.sum(y)
    loc_norm = jnp.sum(((lab >= 0) & ce_lane).astype(f32))              # #(label>=0)

    # --- RPN cross entropy (ignore_index=-1) via softplus of logit diff ---
    sgn = (1 - 2 * lab).astype(f32)                                     # label 0->+1, 1->-1
    tt = sgn * out
    sp = jnp.maximum(tt, 0.0) + jnp.log(1.0 + jnp.exp(-jnp.abs(tt)))
    ce_valid = (lab != -1) & ce_lane
    ce_sum = jnp.sum(jnp.where(ce_valid, sp, 0.0))
    ce_cnt = jnp.sum(ce_valid.astype(f32))

    # --- feature column sums for global mean pooling (head input) ---
    featsum = jnp.sum(feat, axis=0, keepdims=True)                      # (1, 32)

    # --- pack per-tile partials into the (8, 32) accumulator block ---
    row8 = jax.lax.broadcasted_iota(jnp.int32, (8, RPN_OUT_PAD), 0)
    lane8 = jax.lax.broadcasted_iota(jnp.int32, (8, RPN_OUT_PAD), 1)
    scal = jnp.where(lane8 == 0, loc_sum,
           jnp.where(lane8 == 1, loc_norm,
           jnp.where(lane8 == 2, ce_sum, ce_cnt)))
    scal = jnp.where(lane8 < 4, scal, 0.0)
    part = jnp.where(
        row8 == 0, scal,
        jnp.where(row8 == 1, jnp.broadcast_to(featsum, (8, RPN_OUT_PAD)), 0.0))
    acc_ref[...] += part


# ----------------------------------------------------------------------------
# Kernel 2: fused head (cls_loc | score) matmul + ROI losses (incl. gather)
# ----------------------------------------------------------------------------
def _head_fused_kernel(x_ref, w_ref, b_ref, gt_ref, lab_ref, loss_ref,
                       *, sigma, ignore_index):
    f32 = jnp.float32
    out = jnp.dot(x_ref[...], w_ref[...], preferred_element_type=f32) + b_ref[...]
    # out lanes: [0:84] roi_cls_loc (class*4+coord), [84:105] roi_score, rest 0

    lab = lab_ref[...]                                                  # (R, 1) int32
    lane = jax.lax.broadcasted_iota(jnp.int32, out.shape, 1)

    # --- roi loc loss: gather roi_cls_loc[i, gt_label[i]] via lane mask ---
    loc_sel = (lane < HEAD_LOC_W) & ((lane // 4) == lab) & (lab > 0)
    diff = jnp.where(loc_sel, out - gt_ref[...], 0.0)
    ad = jnp.abs(diff)
    sigma2 = sigma * sigma
    y = jnp.where(ad < (1.0 / sigma2), 0.5 * sigma2 * diff * diff, ad - 0.5 / sigma2)
    loc_sum = jnp.sum(y)
    loc_norm = jnp.sum((lab >= 0).astype(f32))
    roi_loc_loss = loc_sum / loc_norm

    # --- roi cross entropy over the 21 score lanes ---
    ce_lane = (lane >= HEAD_LOC_W) & (lane < HEAD_USED)
    z = jnp.where(ce_lane, out, -1e30)
    m = jnp.max(z, axis=-1, keepdims=True)
    e = jnp.where(ce_lane, jnp.exp(z - m), 0.0)
    lse = m + jnp.log(jnp.sum(e, axis=-1, keepdims=True))               # (R, 1)
    pick_sel = ce_lane & ((lane - HEAD_LOC_W) == lab)
    picked = jnp.sum(jnp.where(pick_sel, out, 0.0), axis=-1, keepdims=True)
    validr = lab != ignore_index
    ce_sum = jnp.sum(jnp.where(validr, lse - picked, 0.0))
    ce_cnt = jnp.sum(validr.astype(f32))
    roi_cls_loss = ce_sum / ce_cnt

    # --- pack both scalar losses into one lane-dense (8, 128) block ---
    row8 = jax.lax.broadcasted_iota(jnp.int32, (8, HEAD_PAD), 0)
    lane8 = jax.lax.broadcasted_iota(jnp.int32, (8, HEAD_PAD), 1)
    vals = jnp.where(lane8 == 0, roi_loc_loss,
           jnp.where(lane8 == 1, roi_cls_loss, 0.0))
    loss_ref[...] = jnp.where(row8 == 0, vals, 0.0)


# ----------------------------------------------------------------------------
# Deterministic parameter init (synthetic extractor / RPN / head, pre-fused)
# ----------------------------------------------------------------------------
def init_params(in_ch, key):
    ks = jax.random.split(key, 6)
    rnd = lambda k, s, sc: jax.random.normal(k, s, jnp.float32) * sc

    w_ext = rnd(ks[0], (in_ch, FEAT_CH), 0.1)
    b_ext = jnp.zeros((1, FEAT_CH), jnp.float32)
    w_rpn = rnd(ks[1], (FEAT_CH, FEAT_CH), 0.1)
    b_rpn = jnp.zeros((1, FEAT_CH), jnp.float32)

    w_rpn_loc = rnd(ks[2], (FEAT_CH, N_ANCHOR * 4), 0.05)
    b_rpn_loc = jnp.zeros((N_ANCHOR * 4,), jnp.float32)
    w_rpn_score = rnd(ks[3], (FEAT_CH, N_ANCHOR * 2), 0.05)
    b_rpn_score = jnp.zeros((N_ANCHOR * 2,), jnp.float32)
    # per-anchor fg-bg logit difference columns (for the softplus CE form)
    w_sdiff = w_rpn_score[:, 1::2] - w_rpn_score[:, 0::2]
    b_sdiff = b_rpn_score[1::2] - b_rpn_score[0::2]
    w_out = jnp.zeros((FEAT_CH, RPN_OUT_PAD), jnp.float32)
    w_out = w_out.at[:, :RPN_LOC_W].set(w_rpn_loc)
    w_out = w_out.at[:, RPN_LOC_W:RPN_OUT_USED].set(w_sdiff)
    b_out = jnp.zeros((1, RPN_OUT_PAD), jnp.float32)
    b_out = b_out.at[0, :RPN_LOC_W].set(b_rpn_loc)
    b_out = b_out.at[0, RPN_LOC_W:RPN_OUT_USED].set(b_sdiff)

    # head: fuse cls_loc (84) and score (21) into one 128-lane-padded weight
    w_head_loc = rnd(ks[4], (FEAT_CH + 4, N_CLASS * 4), 0.05)
    w_head_score = rnd(ks[5], (FEAT_CH + 4, N_CLASS), 0.05)
    w_head = jnp.zeros((FEAT_CH + 4, HEAD_PAD), jnp.float32)
    w_head = w_head.at[:, :HEAD_LOC_W].set(w_head_loc)
    w_head = w_head.at[:, HEAD_LOC_W:HEAD_USED].set(w_head_score)
    b_head = jnp.zeros((1, HEAD_PAD), jnp.float32)

    return dict(w_ext=w_ext, b_ext=b_ext, w_rpn=w_rpn, b_rpn=b_rpn,
                w_out=w_out, b_out=b_out, w_head=w_head, b_head=b_head)


# ----------------------------------------------------------------------------
# FasterRCNNTrainer.forward
# ----------------------------------------------------------------------------
def faster_rcnn_trainer_forward(params, imgs, bboxes, labels, scale, tile_m=128):
    n = bboxes.shape[0]
    if n != 1:
        raise ValueError("Currently only batch size 1 is supported.")
    _, C, H, W = imgs.shape
    HW = H * W
    # M-tile: raise towards 512-2048 rows for real images (keep the per-tile
    # footprint well under v7x's 64 MiB VMEM); 128 exercises multi-tile here.
    if HW % tile_m != 0:
        tile_m = HW
    assert tile_m % 8 == 0 and HW % tile_m == 0
    num_tiles = HW // tile_m

    # NCHW -> (H*W, C) pixels-by-channels matrix (single tiny XLA op).
    x = jnp.transpose(imgs[0].reshape(C, HW))                           # (HW, C)

    # TODO(synk): ProposalTargetCreator / AnchorTargetCreator replaced by
    # deterministic synthetic targets (see header comment).
    n_anchor_total = HW * N_ANCHOR
    tkey = jax.random.PRNGKey(0)
    k0, k1, k2, k3, k4 = jax.random.split(tkey, 5)
    sample_roi = jax.random.uniform(k0, (N_SAMPLE_ROI, 4), jnp.float32) * float(H)
    gt_roi_loc = jax.random.normal(k1, (N_SAMPLE_ROI, 4), jnp.float32) * 0.2
    gt_roi_label = jax.random.randint(k2, (N_SAMPLE_ROI,), 0, N_CLASS, jnp.int32)
    gt_rpn_loc = jax.random.normal(k3, (n_anchor_total, 4), jnp.float32) * 0.2
    gt_rpn_label = jax.random.randint(k4, (n_anchor_total,), -1, 2, jnp.int32)

    # lane layouts matching the fused RPN output: [loc 0:16 | per-anchor 16:20]
    gt_loc32 = jnp.pad(gt_rpn_loc.reshape(HW, RPN_LOC_W),
                       ((0, 0), (0, RPN_OUT_PAD - RPN_LOC_W)))
    lab4 = gt_rpn_label.reshape(HW, N_ANCHOR)
    lab32 = jnp.concatenate(
        [jnp.repeat(lab4, 4, axis=1), lab4,
         jnp.full((HW, RPN_OUT_PAD - RPN_OUT_USED), -1, jnp.int32)], axis=1)

    # ---- fused extractor + RPN + RPN-loss kernel (grid over H*W tiles) ----
    sums = pl.pallas_call(
        functools.partial(_rpn_fused_kernel, sigma=float(RPN_SIGMA)),
        out_shape=jax.ShapeDtypeStruct((8, RPN_OUT_PAD), jnp.float32),
        grid=(num_tiles,),
        in_specs=[
            pl.BlockSpec((tile_m, C), lambda i: (i, 0)),
            pl.BlockSpec((C, FEAT_CH), lambda i: (0, 0)),
            pl.BlockSpec((1, FEAT_CH), lambda i: (0, 0)),
            pl.BlockSpec((FEAT_CH, FEAT_CH), lambda i: (0, 0)),
            pl.BlockSpec((1, FEAT_CH), lambda i: (0, 0)),
            pl.BlockSpec((FEAT_CH, RPN_OUT_PAD), lambda i: (0, 0)),
            pl.BlockSpec((1, RPN_OUT_PAD), lambda i: (0, 0)),
            pl.BlockSpec((tile_m, RPN_OUT_PAD), lambda i: (i, 0)),
            pl.BlockSpec((tile_m, RPN_OUT_PAD), lambda i: (i, 0)),
        ],
        # Same output block revisited across the grid -> in-kernel accumulator.
        out_specs=pl.BlockSpec((8, RPN_OUT_PAD), lambda i: (0, 0)),
        compiler_params=pltpu.CompilerParams(
            dimension_semantics=("arbitrary",),
            vmem_limit_bytes=32 * 1024 * 1024),
    )(x, params["w_ext"], params["b_ext"], params["w_rpn"], params["b_rpn"],
      params["w_out"], params["b_out"], gt_loc32, lab32)

    rpn_loc_loss = sums[0, 0] / sums[0, 1]
    rpn_cls_loss = sums[0, 2] / sums[0, 3]
    pooled = sums[1, :FEAT_CH] / float(HW)                              # (FEAT_CH,)

    # head input: pooled feature broadcast per ROI, concatenated with roi coords
    roi_feat = jnp.concatenate(
        [jnp.broadcast_to(pooled[None, :], (N_SAMPLE_ROI, FEAT_CH)), sample_roi],
        axis=1)                                                         # (128, 36)
    gt_roi_loc_tiled = jnp.pad(jnp.tile(gt_roi_loc, (1, N_CLASS)),
                               ((0, 0), (0, HEAD_PAD - HEAD_LOC_W)))    # (128, 128)

    # ---- fused head matmul + ROI-loss kernel ----
    head_losses = pl.pallas_call(
        functools.partial(_head_fused_kernel, sigma=float(ROI_SIGMA),
                          ignore_index=-100),
        out_shape=jax.ShapeDtypeStruct((8, HEAD_PAD), jnp.float32),
        grid=(1,),
        in_specs=[
            pl.BlockSpec((N_SAMPLE_ROI, FEAT_CH + 4), lambda i: (0, 0)),
            pl.BlockSpec((FEAT_CH + 4, HEAD_PAD), lambda i: (0, 0)),
            pl.BlockSpec((1, HEAD_PAD), lambda i: (0, 0)),
            pl.BlockSpec((N_SAMPLE_ROI, HEAD_PAD), lambda i: (0, 0)),
            pl.BlockSpec((N_SAMPLE_ROI, 1), lambda i: (0, 0)),
        ],
        out_specs=pl.BlockSpec((8, HEAD_PAD), lambda i: (0, 0)),
        compiler_params=pltpu.CompilerParams(
            dimension_semantics=("arbitrary",)),
    )(roi_feat, params["w_head"], params["b_head"], gt_roi_loc_tiled,
      gt_roi_label.reshape(N_SAMPLE_ROI, 1).astype(jnp.int32))

    roi_loc_loss = head_losses[0, 0]
    roi_cls_loss = head_losses[0, 1]

    total_loss = rpn_loc_loss + rpn_cls_loss + roi_loc_loss + roi_cls_loss
    return LossTuple(rpn_loc_loss, rpn_cls_loss, roi_loc_loss, roi_cls_loss, total_loss)


# ----------------------------------------------------------------------------
if __name__ == "__main__":
    key = jax.random.PRNGKey(0)
    k_img, k_box, k_lab, k_par = jax.random.split(key, 4)

    # small shapes: N=1 (required), C=4, H=W=16, R=8 gt boxes
    imgs = jax.random.normal(k_img, (1, 4, 16, 16), jnp.float32)
    bboxes = jax.random.uniform(k_box, (1, 8, 4), jnp.float32) * 16.0
    labels = jax.random.randint(k_lab, (1, 8), 0, N_FG_CLASS, jnp.int32)
    scale = 1.0

    params = init_params(in_ch=4, key=k_par)

    losses = faster_rcnn_trainer_forward(params, imgs, bboxes, labels, scale)
    losses = jax.tree_util.tree_map(jax.block_until_ready, losses)

    assert all(bool(jnp.isfinite(v)) for v in losses)
    print("KERNEL_OK")
</pallas_src>

<mosaic_0001>
module attributes {stable_mosaic.version = 11 : i64} {
  func.func @_rpn_fused_kernel(%arg0: i32, %arg1: memref<128x4xf32, #tpu.memory_space<vmem>>, %arg2: memref<4x32xf32, #tpu.memory_space<vmem>>, %arg3: memref<1x32xf32, #tpu.memory_space<vmem>>, %arg4: memref<32x32xf32, #tpu.memory_space<vmem>>, %arg5: memref<1x32xf32, #tpu.memory_space<vmem>>, %arg6: memref<32x32xf32, #tpu.memory_space<vmem>>, %arg7: memref<1x32xf32, #tpu.memory_space<vmem>>, %arg8: memref<128x32xf32, #tpu.memory_space<vmem>>, %arg9: memref<128x32xi32, #tpu.memory_space<vmem>>, %arg10: memref<8x32xf32, #tpu.memory_space<vmem>>) attributes {dimension_semantics = [#tpu.dimension_semantics<arbitrary>], iteration_bounds = array<i64: 2>, scalar_prefetch = 0 : i64, scratch_operands = 0 : i64, tpu.core_type = #tpu.core_type<tc>, window_params = [{transform_indices = @transform_0, window_bounds = array<i64: 128, 4>}, {pipeline_mode = #tpu.pipeline_mode<synchronous>, transform_indices = @transform_1, window_bounds = array<i64: 4, 32>}, {pipeline_mode = #tpu.pipeline_mode<synchronous>, transform_indices = @transform_2, window_bounds = array<i64: 1, 32>}, {pipeline_mode = #tpu.pipeline_mode<synchronous>, transform_indices = @transform_3, window_bounds = array<i64: 32, 32>}, {pipeline_mode = #tpu.pipeline_mode<synchronous>, transform_indices = @transform_4, window_bounds = array<i64: 1, 32>}, {pipeline_mode = #tpu.pipeline_mode<synchronous>, transform_indices = @transform_5, window_bounds = array<i64: 32, 32>}, {pipeline_mode = #tpu.pipeline_mode<synchronous>, transform_indices = @transform_6, window_bounds = array<i64: 1, 32>}, {transform_indices = @transform_7, window_bounds = array<i64: 128, 32>}, {transform_indices = @transform_8, window_bounds = array<i64: 128, 32>}, {pipeline_mode = #tpu.pipeline_mode<synchronous>, transform_indices = @transform_9, window_bounds = array<i64: 8, 32>}]} {
    %c0_i32 = arith.constant 0 : i32
    %0 = arith.cmpi eq, %arg0, %c0_i32 : i32
    %1 = arith.extui %0 : i1 to i32
    %c0_i32_0 = arith.constant 0 : i32
    %2 = arith.cmpi ne, %1, %c0_i32_0 : i32
    scf.if %2 {
      %cst_49 = arith.constant 0.000000e+00 : f32
      %125 = vector.broadcast %cst_49 : f32 to vector<8x32xf32>
      %c0_50 = arith.constant 0 : index
      %c0_51 = arith.constant 0 : index
      %126 = vector.load %arg10[%c0_50, %c0_51] : memref<8x32xf32, #tpu.memory_space<vmem>>, vector<8x32xf32>
      tpu.vector_store %arg10[%c0_50, %c0_51], %125 {strides = array<i32>} : memref<8x32xf32, #tpu.memory_space<vmem>>, vector<8x32xf32>,
    } else {
    }
    %c0 = arith.constant 0 : index
    %c0_1 = arith.constant 0 : index
    %3 = vector.load %arg1[%c0, %c0_1] : memref<128x4xf32, #tpu.memory_space<vmem>>, vector<128x4xf32>
    %c0_2 = arith.constant 0 : index
    %c0_3 = arith.constant 0 : index
    %4 = vector.load %arg2[%c0_2, %c0_3] : memref<4x32xf32, #tpu.memory_space<vmem>>, vector<4x32xf32>
    %cst = arith.constant dense<0.000000e+00> : vector<128x32xf32>
    %5 = tpu.matmul %3, %4, %cst {dimension_numbers = #tpu.dot_dimension_numbers<[1], [0], [0], [1], [0, 0, 1, 1], [], []>} : vector<128x4xf32>, vector<4x32xf32>, vector<128x32xf32> -> vector<128x32xf32>
    %c0_4 = arith.constant 0 : index
    %c0_5 = arith.constant 0 : index
    %6 = vector.load %arg3[%c0_4, %c0_5] : memref<1x32xf32, #tpu.memory_space<vmem>>, vector<1x32xf32>
    %7 = vector.broadcast %6 : vector<1x32xf32> to vector<128x32xf32>
    %8 = arith.addf %5, %7 : vector<128x32xf32>
    %cst_6 = arith.constant 0.000000e+00 : f32
    %9 = vector.broadcast %cst_6 : f32 to vector<128x32xf32>
    %10 = arith.maximumf %8, %9 : vector<128x32xf32>
    %c0_7 = arith.constant 0 : index
    %c0_8 = arith.constant 0 : index
    %11 = vector.load %arg4[%c0_7, %c0_8] : memref<32x32xf32, #tpu.memory_space<vmem>>, vector<32x32xf32>
    %cst_9 = arith.constant dense<0.000000e+00> : vector<128x32xf32>
    %12 = tpu.matmul %10, %11, %cst_9 {dimension_numbers = #tpu.dot_dimension_numbers<[1], [0], [0], [1], [0, 0, 1, 1], [], []>} : vector<128x32xf32>, vector<32x32xf32>, vector<128x32xf32> -> vector<128x32xf32>
    %c0_10 = arith.constant 0 : index
    %c0_11 = arith.constant 0 : index
    %13 = vector.load %arg5[%c0_10, %c0_11] : memref<1x32xf32, #tpu.memory_space<vmem>>, vector<1x32xf32>
    %14 = vector.broadcast %13 : vector<1x32xf32> to vector<128x32xf32>
    %15 = arith.addf %12, %14 : vector<128x32xf32>
    %cst_12 = arith.constant 0.000000e+00 : f32
    %16 = vector.broadcast %cst_12 : f32 to vector<128x32xf32>
    %17 = arith.maximumf %15, %16 : vector<128x32xf32>
    %c0_13 = arith.constant 0 : index
    %c0_14 = arith.constant 0 : index
    %18 = vector.load %arg6[%c0_13, %c0_14] : memref<32x32xf32, #tpu.memory_space<vmem>>, vector<32x32xf32>
    %cst_15 = arith.constant dense<0.000000e+00> : vector<128x32xf32>
    %19 = tpu.matmul %17, %18, %cst_15 {dimension_numbers = #tpu.dot_dimension_numbers<[1], [0], [0], [1], [0, 0, 1, 1], [], []>} : vector<128x32xf32>, vector<32x32xf32>, vector<128x32xf32> -> vector<128x32xf32>
    %c0_16 = arith.constant 0 : index
    %c0_17 = arith.constant 0 : index
    %20 = vector.load %arg7[%c0_16, %c0_17] : memref<1x32xf32, #tpu.memory_space<vmem>>, vector<1x32xf32>
    %21 = vector.broadcast %20 : vector<1x32xf32> to vector<128x32xf32>
    %22 = arith.addf %19, %21 : vector<128x32xf32>
    %23 = tpu.iota {dimensions = array<i32: 1>} : vector<128x32xi32>
    %c0_18 = arith.constant 0 : index
    %c0_19 = arith.constant 0 : index
    %24 = vector.load %arg9[%c0_18, %c0_19] : memref<128x32xi32, #tpu.memory_space<vmem>>, vector<128x32xi32>
    %c0_20 = arith.constant 0 : index
    %c0_21 = arith.constant 0 : index
    %25 = vector.load %arg8[%c0_20, %c0_21] : memref<128x32xf32, #tpu.memory_space<vmem>>, vector<128x32xf32>
    %c16_i32 = arith.constant 16 : i32
    %26 = vector.broadcast %c16_i32 : i32 to vector<128x32xi32>
    %27 = arith.cmpi slt, %23, %26 : vector<128x32xi32>
    %c16_i32_22 = arith.constant 16 : i32
    %28 = vector.broadcast %c16_i32_22 : i32 to vector<128x32xi32>
    %29 = arith.cmpi sge, %23, %28 : vector<128x32xi32>
    %c20_i32 = arith.constant 20 : i32
    %30 = vector.broadcast %c20_i32 : i32 to vector<128x32xi32>
    %31 = arith.cmpi slt, %23, %30 : vector<128x32xi32>
    %32 = arith.andi %29, %31 : vector<128x32xi1>
    %c0_i32_23 = arith.constant 0 : i32
    %33 = vector.broadcast %c0_i32_23 : i32 to vector<128x32xi32>
    %34 = arith.cmpi sgt, %24, %33 : vector<128x32xi32>
    %35 = arith.andi %34, %27 : vector<128x32xi1>
    %36 = arith.subf %22, %25 : vector<128x32xf32>
    %cst_24 = arith.constant 0.000000e+00 : f32
    %37 = vector.broadcast %cst_24 : f32 to vector<128x32xf32>
    %38 = arith.select %35, %36, %37 : vector<128x32xi1>, vector<128x32xf32>
    %39 = math.absf %38 : vector<128x32xf32>
    %cst_25 = arith.constant 0.111111112 : f32
    %40 = vector.broadcast %cst_25 : f32 to vector<128x32xf32>
    %41 = arith.cmpf olt, %39, %40 : vector<128x32xf32>
    %cst_26 = arith.constant 4.500000e+00 : f32
    %42 = vector.broadcast %cst_26 : f32 to vector<128x32xf32>
    %43 = arith.mulf %42, %38 : vector<128x32xf32>
    %44 = arith.mulf %43, %38 : vector<128x32xf32>
    %cst_27 = arith.constant 0.055555556 : f32
    %45 = vector.broadcast %cst_27 : f32 to vector<128x32xf32>
    %46 = arith.subf %39, %45 : vector<128x32xf32>
    %47 = arith.select %41, %44, %46 : vector<128x32xi1>, vector<128x32xf32>
    %48 = vector.shape_cast %47 : vector<128x32xf32> to vector<1x128x32xf32>
    %cst_28 = arith.constant dense<0.000000e+00> : vector<1xf32>
    %49 = vector.multi_reduction <add>, %48, %cst_28 [1, 2] : vector<1x128x32xf32> to vector<1xf32>
    %50 = vector.shape_cast %49 : vector<1xf32> to vector<1x1x1xf32>
    %51 = vector.extract %50[0, 0, 0] : f32 from vector<1x1x1xf32>
    %c0_i32_29 = arith.constant 0 : i32
    %52 = vector.broadcast %c0_i32_29 : i32 to vector<128x32xi32>
    %53 = arith.cmpi sge, %24, %52 : vector<128x32xi32>
    %54 = arith.andi %53, %32 : vector<128x32xi1>
    %55 = arith.extui %54 : vector<128x32xi1> to vector<128x32xi32>
    %56 = arith.sitofp %55 : vector<128x32xi32> to vector<128x32xf32>
    %57 = vector.shape_cast %56 : vector<128x32xf32> to vector<1x128x32xf32>
    %cst_30 = arith.constant dense<0.000000e+00> : vector<1xf32>
    %58 = vector.multi_reduction <add>, %57, %cst_30 [1, 2] : vector<1x128x32xf32> to vector<1xf32>
    %59 = vector.shape_cast %58 : vector<1xf32> to vector<1x1x1xf32>
    %60 = vector.extract %59[0, 0, 0] : f32 from vector<1x1x1xf32>
    %c2_i32 = arith.constant 2 : i32
    %61 = vector.broadcast %c2_i32 : i32 to vector<128x32xi32>
    %62 = arith.muli %61, %24 : vector<128x32xi32>
    %c1_i32 = arith.constant 1 : i32
    %63 = vector.broadcast %c1_i32 : i32 to vector<128x32xi32>
    %64 = arith.subi %63, %62 : vector<128x32xi32>
    %65 = arith.sitofp %64 : vector<128x32xi32> to vector<128x32xf32>
    %66 = arith.mulf %65, %22 : vector<128x32xf32>
    %cst_31 = arith.constant 0.000000e+00 : f32
    %67 = vector.broadcast %cst_31 : f32 to vector<128x32xf32>
    %68 = arith.maximumf %66, %67 : vector<128x32xf32>
    %69 = math.absf %66 : vector<128x32xf32>
    %cst_32 = arith.constant 0.000000e+00 : f32
    %70 = vector.broadcast %cst_32 : f32 to vector<128x32xf32>
    %71 = arith.subf %70, %69 : vector<128x32xf32>
    %72 = math.exp %71 : vector<128x32xf32>
    %cst_33 = arith.constant 1.000000e+00 : f32
    %73 = vector.broadcast %cst_33 : f32 to vector<128x32xf32>
    %74 = arith.addf %73, %72 : vector<128x32xf32>
    %75 = math.log %74 : vector<128x32xf32>
    %76 = arith.addf %68, %75 : vector<128x32xf32>
    %c-1_i32 = arith.constant -1 : i32
    %77 = vector.broadcast %c-1_i32 : i32 to vector<128x32xi32>
    %78 = arith.cmpi ne, %24, %77 : vector<128x32xi32>
    %79 = arith.andi %78, %32 : vector<128x32xi1>
    %cst_34 = arith.constant 0.000000e+00 : f32
    %80 = vector.broadcast %cst_34 : f32 to vector<128x32xf32>
    %81 = arith.select %79, %76, %80 : vector<128x32xi1>, vector<128x32xf32>
    %82 = vector.shape_cast %81 : vector<128x32xf32> to vector<1x128x32xf32>
    %cst_35 = arith.constant dense<0.000000e+00> : vector<1xf32>
    %83 = vector.multi_reduction <add>, %82, %cst_35 [1, 2] : vector<1x128x32xf32> to vector<1xf32>
    %84 = vector.shape_cast %83 : vector<1xf32> to vector<1x1x1xf32>
    %85 = vector.extract %84[0, 0, 0] : f32 from vector<1x1x1xf32>
    %86 = arith.extui %79 : vector<128x32xi1> to vector<128x32xi32>
    %87 = arith.sitofp %86 : vector<128x32xi32> to vector<128x32xf32>
    %88 = vector.shape_cast %87 : vector<128x32xf32> to vector<1x128x32xf32>
    %cst_36 = arith.constant dense<0.000000e+00> : vector<1xf32>
    %89 = vector.multi_reduction <add>, %88, %cst_36 [1, 2] : vector<1x128x32xf32> to vector<1xf32>
    %90 = vector.shape_cast %89 : vector<1xf32> to vector<1x1x1xf32>
    %91 = vector.extract %90[0, 0, 0] : f32 from vector<1x1x1xf32>
    %cst_37 = arith.constant dense<0.000000e+00> : vector<32xf32>
    %92 = vector.multi_reduction <add>, %10, %cst_37 [0] : vector<128x32xf32> to vector<32xf32>
    %93 = vector.shape_cast %92 : vector<32xf32> to vector<1x32xf32>
    %94 = tpu.iota {dimensions = array<i32: 0>} : vector<8x32xi32>
    %95 = tpu.iota {dimensions = array<i32: 1>} : vector<8x32xi32>
    %c0_i32_38 = arith.constant 0 : i32
    %96 = vector.broadcast %c0_i32_38 : i32 to vector<8x32xi32>
    %97 = arith.cmpi eq, %95, %96 : vector<8x32xi32>
    %c1_i32_39 = arith.constant 1 : i32
    %98 = vector.broadcast %c1_i32_39 : i32 to vector<8x32xi32>
    %99 = arith.cmpi eq, %95, %98 : vector<8x32xi32>
    %c2_i32_40 = arith.constant 2 : i32
    %100 = vector.broadcast %c2_i32_40 : i32 to vector<8x32xi32>
    %101 = arith.cmpi eq, %95, %100 : vector<8x32xi32>
    %102 = vector.broadcast %85 : f32 to vector<8x32xf32>
    %103 = vector.broadcast %91 : f32 to vector<8x32xf32>
    %104 = arith.select %101, %102, %103 : vector<8x32xi1>, vector<8x32xf32>
    %105 = vector.broadcast %60 : f32 to vector<8x32xf32>
    %106 = arith.select %99, %105, %104 : vector<8x32xi1>, vector<8x32xf32>
    %107 = vector.broadcast %51 : f32 to vector<8x32xf32>
    %108 = arith.select %97, %107, %106 : vector<8x32xi1>, vector<8x32xf32>
    %c4_i32 = arith.constant 4 : i32
    %109 = vector.broadcast %c4_i32 : i32 to vector<8x32xi32>
    %110 = arith.cmpi slt, %95, %109 : vector<8x32xi32>
    %cst_41 = arith.constant 0.000000e+00 : f32
    %111 = vector.broadcast %cst_41 : f32 to vector<8x32xf32>
    %112 = arith.select %110, %108, %111 : vector<8x32xi1>, vector<8x32xf32>
    %c0_i32_42 = arith.constant 0 : i32
    %113 = vector.broadcast %c0_i32_42 : i32 to vector<8x32xi32>
    %114 = arith.cmpi eq, %94, %113 : vector<8x32xi32>
    %c1_i32_43 = arith.constant 1 : i32
    %115 = vector.broadcast %c1_i32_43 : i32 to vector<8x32xi32>
    %116 = arith.cmpi eq, %94, %115 : vector<8x32xi32>
    %117 = vector.shape_cast %93 : vector<1x32xf32> to vector<1x32xf32>
    %118 = vector.broadcast %117 : vector<1x32xf32> to vector<8x32xf32>
    %cst_44 = arith.constant 0.000000e+00 : f32
    %119 = vector.broadcast %cst_44 : f32 to vector<8x32xf32>
    %120 = arith.select %116, %118, %119 : vector<8x32xi1>, vector<8x32xf32>
    %121 = arith.select %114, %112, %120 : vector<8x32xi1>, vector<8x32xf32>
    %c0_45 = arith.constant 0 : index
    %c0_46 = arith.constant 0 : index
    %122 = vector.load %arg10[%c0_45, %c0_46] : memref<8x32xf32, #tpu.memory_space<vmem>>, vector<8x32xf32>
    %123 = arith.addf %122, %121 : vector<8x32xf32>
    %c0_47 = arith.constant 0 : index
    %c0_48 = arith.constant 0 : index
    %124 = vector.load %arg10[%c0_47, %c0_48] : memref<8x32xf32, #tpu.memory_space<vmem>>, vector<8x32xf32>
    tpu.vector_store %arg10[%c0_47, %c0_48], %123 {strides = array<i32>} : memref<8x32xf32, #tpu.memory_space<vmem>>, vector<8x32xf32>,
    return
  }
  func.func @transform_0(%arg0: i32) -> (i32, i32) {
    %c0_i32 = arith.constant 0 : i32
    %c0_i32_0 = arith.constant 0 : i32
    return %arg0, %c0_i32 : i32, i32
  }
  func.func @transform_1(%arg0: i32) -> (i32, i32) {
    %c0_i32 = arith.constant 0 : i32
    %c0_i32_0 = arith.constant 0 : i32
    %c0_i32_1 = arith.constant 0 : i32
    return %c0_i32, %c0_i32_0 : i32, i32
  }
  func.func @transform_2(%arg0: i32) -> (i32, i32) {
    %c0_i32 = arith.constant 0 : i32
    %c0_i32_0 = arith.constant 0 : i32
    %c0_i32_1 = arith.constant 0 : i32
    return %c0_i32, %c0_i32_0 : i32, i32
  }
  func.func @transform_3(%arg0: i32) -> (i32, i32) {
    %c0_i32 = arith.constant 0 : i32
    %c0_i32_0 = arith.constant 0 : i32
    %c0_i32_1 = arith.constant 0 : i32
    return %c0_i32, %c0_i32_0 : i32, i32
  }
  func.func @transform_4(%arg0: i32) -> (i32, i32) {
    %c0_i32 = arith.constant 0 : i32
    %c0_i32_0 = arith.constant 0 : i32
    %c0_i32_1 = arith.constant 0 : i32
    return %c0_i32, %c0_i32_0 : i32, i32
  }
  func.func @transform_5(%arg0: i32) -> (i32, i32) {
    %c0_i32 = arith.constant 0 : i32
    %c0_i32_0 = arith.constant 0 : i32
    %c0_i32_1 = arith.constant 0 : i32
    return %c0_i32, %c0_i32_0 : i32, i32
  }
  func.func @transform_6(%arg0: i32) -> (i32, i32) {
    %c0_i32 = arith.constant 0 : i32
    %c0_i32_0 = arith.constant 0 : i32
    %c0_i32_1 = arith.constant 0 : i32
    return %c0_i32, %c0_i32_0 : i32, i32
  }
  func.func @transform_7(%arg0: i32) -> (i32, i32) {
    %c0_i32 = arith.constant 0 : i32
    %c0_i32_0 = arith.constant 0 : i32
    return %arg0, %c0_i32 : i32, i32
  }
  func.func @transform_8(%arg0: i32) -> (i32, i32) {
    %c0_i32 = arith.constant 0 : i32
    %c0_i32_0 = arith.constant 0 : i32
    return %arg0, %c0_i32 : i32, i32
  }
  func.func @transform_9(%arg0: i32) -> (i32, i32) {
    %c0_i32 = arith.constant 0 : i32
    %c0_i32_0 = arith.constant 0 : i32
    %c0_i32_1 = arith.constant 0 : i32
    return %c0_i32, %c0_i32_0 : i32, i32
  }
}

</mosaic_0001>

<bundles_post_ra>
// kernel: tpu_custom_call.1
= control target key start
LH: loop header
LB: loop body
LE: loop exit
PB: predicated region body
PF: predicated region fallthrough
CT: control target
= control target key end

     0   :  { %14 = vsyncpa [#allocation3], 0  ;;  %s1932_s30 = smov 0   ;;  %s3015_s0 = inlined_call_operand.vmem [shape: f32[256,4], index: 0, kind: input, shape index: {}]   ;;  %s3016_s1 = inlined_call_operand.vmem [shape: f32[4,32], index: 1, kind: input, shape index: {}]   ;;  %s3017_s2 = inlined_call_operand.vmem [shape: f32[1,32], index: 2, kind: input, shape index: {}]   ;;  %s3018_s3 = inlined_call_operand.vmem [shape: f32[32,32], index: 3, kind: input, shape index: {}]   ;;  %s3019_s4 = inlined_call_operand.vmem [shape: f32[1,32], index: 4, kind: input, shape index: {}]   ;;  %s3020_s5 = inlined_call_operand.vmem [shape: f32[32,32], index: 5, kind: input, shape index: {}]   ;;  %s3021_s6 = inlined_call_operand.vmem [shape: f32[1,32], index: 6, kind: input, shape index: {}]   ;;  %s3022_s7 = inlined_call_operand.vmem [shape: f32[256,32], index: 7, kind: input, shape index: {}]   ;;  %s3023_s8 = inlined_call_operand.vmem [shape: s32[256,32], index: 8, kind: input, shape index: {}]   ;;  %s3024_s9 = inlined_call_operand.hbm [shape: f32[8,32], index: 9, kind: output, shape index: {}]  }
   0x1 LB: > { %s1938_s10 = sadd.s32 4294967295, %s1877_s30   ;;  %p1628_p0 = scmp.ge.s32.totalorder %s1877_s30, 1  ;;  %s1877_s30 = sphi %s1932_s30, %s20_s30  }
   0x2   : > { %p306_p1 = scmp.lt.s32.totalorder %s1877_s30, 3 }
   0x4   : > { %p307_p2 = pnand %p1628_p0, %p306_p1 }
   0x5   : > { %s1629_s11 = sshll.u32 (!%p307_p2), %s1938_s10, 4  ;;  %p1635_p4 = scmp.ne.s32.totalorder (!%p307_p2), %s1938_s10, 0 }
   0x6   : > { %310 = sbr.rel (%p307_p2) target bundleno = 770 (0x302), region = 56  ;;  %p348_p3 = scmp.lt.s32.totalorder (!%p307_p2), %s1629_s11, 31 }
   0xb   : > { %s3116_s11 = smov (!%p348_p3, %s1629_s11), 31  ;;  %368 = sbr.rel (%p1635_p4) target bundleno = 18 (0x12), region = 60 }
   0xc   : > { %s1630_s12 = sshll.u32 %s3116_s11, 3 }
   0xd   : > { %s1946_s15 = scalar_lea.vmem %s3015_s0, %s1630_s12  ;;  %s1951_s18 = scalar_lea.vmem %s3022_s7, %s1630_s12 }
   0xe   : > { %s1956_s21 = scalar_lea.vmem %s3023_s8, %s1630_s12 }
  0x10   : > { %vm369_vm0 = vcmask 261120   ;;  %v1879_v0 = vmov 0.0  }
  0x11   : > { %370 = vst.msk [vmem:[#allocation2] sm:$0xff] %vm369_vm0, %v1879_v0 }
  0x12 PF: > { %v387_v1 = vld [vmem:[%s3016_s1] sm:$0xf]  ;;  %vm441_vm1 = vcmask 1043456   ;;  %vm392_vm2 = vcmask 31744   ;;  %v372_v3 = vld [vmem:[%s1946_s15 + $0x8] sm:$0xff]  ;;  %v373_v4 = vld [vmem:[%s1946_s15 + $0x10] sm:$0xff] }
  0x13   : > { %v371_v2 = vld [vmem:[%s1946_s15] sm:$0xff]  ;;  %1636 = vmatpush.msk.msra.mxu0 %vm441_vm1, %v387_v1  ;;  %1737 = vmatpush.msk.msra.mxu3 %vm441_vm1, %v387_v1  ;;  %v374_v5 = vld [vmem:[%s1946_s15 + $0x18] sm:$0xff]  ;;  %v376_v7 = vld [vmem:[%s1946_s15 + $0x28] sm:$0xff]  ;;  %vm534_vm3 = vcmask 261120   ;;  %s1881_s14 = smov [#allocation2]   ;;  %s1561_s19 = sshll.u32 %s3024_s9, 4  ;;  %s1562_s19 = int_to_ptr.hbm [resolvable:$true] %s1561_s19 }
  0x14   : > { %1637 = vmatmul.msk.f32.vlgmr.msra.gmra.mxu0 %vm392_vm2, %v371_v2  ;;  %v375_v6 = vld [vmem:[%s1946_s15 + $0x20] sm:$0xff]  ;;  %v377_v8 = vld [vmem:[%s1946_s15 + $0x30] sm:$0xff]  ;;  %v384_v9 = vld [vmem:[%s1946_s15 + $0x68] sm:$0xff]  ;;  %p1758_p5 = scmp.eq.s32.totalorder %s1938_s10, 1 }
  0x15   : > { %1650 = vmatmul.msk.f32.vlgmr.msra.gmra.mxu3 %vm392_vm2, %v384_v9  ;;  %v378_v10 = vld [vmem:[%s1946_s15 + $0x38] sm:$0xff]  ;;  %v385_v11 = vld [vmem:[%s1946_s15 + $0x70] sm:$0xff]  ;;  %v379_v12 = vld [vmem:[%s1946_s15 + $0x40] sm:$0xff] }
  0x16   : > { %v386_v13 = vld [vmem:[%s1946_s15 + $0x78] sm:$0xff]  ;;  %v380_v15 = vld [vmem:[%s1946_s15 + $0x48] sm:$0xff]  ;;  %v381_v16 = vld [vmem:[%s1946_s15 + $0x50] sm:$0xff] }
  0x17   : > { %v529_v14 = vld [vmem:[%s3018_s3 + $0x18] sm:$0xff]  ;;  %v528_v18 = vld [vmem:[%s3018_s3 + $0x10] sm:$0xff]  ;;  %v383_v19 = vld [vmem:[%s1946_s15 + $0x60] sm:$0xff] }
  0x18   : > { %595 = vmatpush.msra.mxu1 %v529_v14  ;;  %1738 = vmatpush.msrb.mxu3 %v529_v14  ;;  %v382_v17 = vld [vmem:[%s1946_s15 + $0x58] sm:$0xff]  ;;  %v527_v20 = vld [vmem:[%s3018_s3 + $0x8] sm:$0xff]  ;;  %v526_v21 = vld [vmem:[%s3018_s3] sm:$0xff]  ;;  %s1559_s15 = sshll.u32 %s1881_s14, 4  ;;  %s1560_s15 = int_to_ptr.vmem [resolvable:$true] %s1559_s15 }
  0x19   : > { %v2009_v22 = vld [vmem:[%s3017_s2] ss:$0 sm:$0xff] }
  0x1a   : > { %596 = vmatpush.msra.mxu1 %v528_v18  ;;  %1739 = vmatpush.msrb.mxu3 %v528_v18 }
  0x1c   : > { %1638 = vmatmul.msk.f32.gmra.mxu0 %vm392_vm2, %v372_v3  ;;  %597 = vmatpush.msra.mxu1 %v527_v20 }
  0x1d   : > { %1651 = vmatmul.msk.f32.gmra.mxu3 %vm392_vm2, %v385_v11 }
  0x1e   : > { %1740 = vmatpush.msrb.mxu3 %v527_v20  ;;  %598 = vmatpush.msra.mxu1 %v526_v21  ;;  %v667_v20 = vld [vmem:[%s3020_s5 + $0x18] sm:$0xff] }
  0x1f   : > { %732 = vmatpush.msra.mxu2 %v667_v20 }
  0x20   : > { %1741 = vmatpush.msrb.mxu3 %v526_v21 }
  0x22   : > { %1742 = vmatpush.msra.mxu3 %v667_v20 }
  0x24   : > { %1639 = vmatmul.msk.f32.gmra.mxu0 %vm392_vm2, %v373_v4 }
  0x25   : > { %1652 = vmatmul.msk.f32.gmra.mxu3 %vm392_vm2, %v386_v13 }
  0x2c   : > { %1640 = vmatmul.msk.f32.gmra.mxu0 %vm392_vm2, %v374_v5 }
  0x34   : > { %1641 = vmatmul.msk.f32.gmra.mxu0 %vm392_vm2, %v375_v6 }
  0x3c   : > { %1642 = vmatmul.msk.f32.gmra.mxu0 %vm392_vm2, %v376_v7 }
  0x44   : > { %1643 = vmatmul.msk.f32.gmra.mxu0 %vm392_vm2, %v377_v8 }
  0x4c   : > { %1644 = vmatmul.msk.f32.gmra.mxu0 %vm392_vm2, %v378_v10 }
  0x54   : > { %1645 = vmatmul.msk.f32.gmra.mxu0 %vm392_vm2, %v379_v12 }
  0x5c   : > { %1646 = vmatmul.msk.f32.gmra.mxu0 %vm392_vm2, %v380_v15 }
  0x64   : > { %1647 = vmatmul.msk.f32.gmra.mxu0 %vm392_vm2, %v381_v16 }
  0x6c   : > { %1648 = vmatmul.msk.f32.gmra.mxu0 %vm392_vm2, %v382_v17 }
  0x74   : > { %1649 = vmatmul.msk.f32.gmra.mxu0 %vm392_vm2, %v383_v19 }
  0x91   : > { %v462_v23 = vpop.f32.mrf.mxu0 }
  0x92   : > { %v463_v24 = vadd.f32 %v2009_v22, %v462_v23 }
  0x94   : > { %v510_v25 = vmax.f32 %v463_v24, 0.0 }
  0x96   : > { %1653 = vmatmul.msk.f32.vlgmr.msra.gmra.mxu1 %vm534_vm3, %v510_v25  ;;  %v1495_v29 = vsel %vm534_vm3, %v510_v25, 0.0 }
  0x98   : > { %v501_v5 = vpop.f32.mrf.mxu3 }
  0x99   : > { %v465_v26 = vpop.f32.mrf.mxu0  ;;  %v502_v18 = vadd.f32 %v2009_v22, %v501_v5 }
  0x9a   : > { %v466_v27 = vadd.f32 %v2009_v22, %v465_v26 }
  0x9b   : > { %v523_v26 = vmax.f32 %v502_v18, 0.0 }
  0x9c   : > { %v511_v28 = vmax.f32 %v466_v27, 0.0 }
  0x9e   : > { %v1496_v30 = vsel %vm534_vm3, %v511_v28, 0.0  ;;  %1654 = vmatmul.msk.f32.gmra.mxu1 %vm534_vm3, %v511_v28 }
  0x9f   : > { %v1497_v31 = vadd.f32 %v1496_v30, %v1495_v29  ;;  %v666_v29 = vld [vmem:[%s3020_s5 + $0x10] sm:$0xff] }
  0xa0   : > { %v504_v12 = vpop.f32.mrf.mxu3  ;;  %733 = vmatpush.msra.mxu2 %v666_v29  ;;  %1743 = vmatpush.msra.mxu3 %v666_v29 }
  0xa1   : > { %v468_v32 = vpop.f32.mrf.mxu0  ;;  %v505_v24 = vadd.f32 %v2009_v22, %v504_v12 }
  0xa2   : > { %v469_v33 = vadd.f32 %v2009_v22, %v468_v32  ;;  %v665_v32 = vld [vmem:[%s3020_s5 + $0x8] sm:$0xff] }
  0xa3   : > { %v524_v30 = vmax.f32 %v505_v24, 0.0  ;;  %734 = vmatpush.msra.mxu2 %v665_v32  ;;  %1744 = vmatpush.msra.mxu3 %v665_v32  ;;  %v2117_v32 = vld [vmem:[%s1956_s21 + $0x8] sm:$0xff] }
  0xa4   : > { %v512_v34 = vmax.f32 %v469_v33, 0.0  ;;  %v1520_v33 = vsel %vm534_vm3, %v523_v26, 0.0  ;;  %vm824_vm10 = vcmp.gt.s32.totalorder %v2117_v32, 0  ;;  %vm1024_vm12 = vcmp.ge.s32.totalorder %v2117_v32, 0 }
  0xa5   : > { %vm1336_vm2 = vcmp.ne.s32.totalorder %v2117_v32, 4294967295 }
  0xa6   : > { %v1498_v35 = vsel %vm534_vm3, %v512_v34, 0.0  ;;  %1655 = vmatmul.msk.f32.gmra.mxu1 %vm534_vm3, %v512_v34 }
  0xa7   : > { %v1499_v36 = vadd.f32 %v1498_v35, %v1497_v31  ;;  %v664_v35 = vld [vmem:[%s3020_s5] sm:$0xff] }
  0xa8   : > { %v507_v23 = vpop.f32.mrf.mxu3  ;;  %735 = vmatpush.msra.mxu2 %v664_v35  ;;  %1745 = vmatpush.msra.mxu3 %v664_v35 }
  0xa9   : > { %v471_v37 = vpop.f32.mrf.mxu0  ;;  %v508_v28 = vadd.f32 %v2009_v22, %v507_v23 }
  0xaa   : > { %v472_v38 = vadd.f32 %v2009_v22, %v471_v37  ;;  %v1522_v37 = vsel %vm534_vm3, %v524_v30, 0.0 }
  0xac   : > { %v513_v39 = vmax.f32 %v472_v38, 0.0 }
  0xae   : > { %v1500_v40 = vsel %vm534_vm3, %v513_v39, 0.0  ;;  %1656 = vmatmul.msk.f32.gmra.mxu1 %vm534_vm3, %v513_v39 }
  0xaf   : > { %v1501_v41 = vadd.f32 %v1500_v40, %v1499_v36 }
  0xb1   : > { %v474_v42 = vpop.f32.mrf.mxu0 }
  0xb2   : > { %v475_v43 = vadd.f32 %v2009_v22, %v474_v42  ;;  %v2076_v42 = vld [vmem:[%s3019_s4] ss:$0 sm:$0xff] }
  0xb4   : > { %v514_v44 = vmax.f32 %v475_v43, 0.0 }
  0xb6   : > { %v1502_v45 = vsel %vm534_vm3, %v514_v44, 0.0  ;;  %1657 = vmatmul.msk.f32.gmra.mxu1 %vm534_vm3, %v514_v44 }
  0xb7   : > { %v1503_v46 = vadd.f32 %v1502_v45, %v1501_v41 }
  0xb9   : > { %v477_v47 = vpop.f32.mrf.mxu0 }
  0xba   : > { %v478_v48 = vadd.f32 %v2009_v22, %v477_v47 }
  0xbc   : > { %v515_v49 = vmax.f32 %v478_v48, 0.0 }
  0xbe   : > { %v1504_v50 = vsel %vm534_vm3, %v515_v49, 0.0  ;;  %1658 = vmatmul.msk.f32.gmra.mxu1 %vm534_vm3, %v515_v49 }
  0xbf   : > { %v1505_v51 = vadd.f32 %v1504_v50, %v1503_v46 }
  0xc1   : > { %v480_v52 = vpop.f32.mrf.mxu0 }
  0xc2   : > { %v481_v53 = vadd.f32 %v2009_v22, %v480_v52 }
  0xc4   : > { %v516_v54 = vmax.f32 %v481_v53, 0.0 }
  0xc6   : > { %v1506_v55 = vsel %vm534_vm3, %v516_v54, 0.0  ;;  %1659 = vmatmul.msk.f32.gmra.mxu1 %vm534_vm3, %v516_v54 }
  0xc7   : > { %v1507_v56 = vadd.f32 %v1506_v55, %v1505_v51 }
  0xc9   : > { %v483_v57 = vpop.f32.mrf.mxu0 }
  0xca   : > { %v484_v58 = vadd.f32 %v2009_v22, %v483_v57 }
  0xcc   : > { %v517_v59 = vmax.f32 %v484_v58, 0.0 }
  0xce   : > { %v1508_v60 = vsel %vm534_vm3, %v517_v59, 0.0  ;;  %1660 = vmatmul.msk.f32.gmra.mxu1 %vm534_vm3, %v517_v59 }
  0xcf   : > { %v1509_v61 = vadd.f32 %v1508_v60, %v1507_v56 }
  0xd1   : > { %v486_v62 = vpop.f32.mrf.mxu0 }
  0xd2   : > { %v487_v63 = vadd.f32 %v2009_v22, %v486_v62 }
  0xd4   : > { %v518_v0 = vmax.f32 %v487_v63, 0.0 }
  0xd6   : > { %v1510_v1 = vsel %vm534_vm3, %v518_v0, 0.0  ;;  %1661 = vmatmul.msk.f32.gmra.mxu1 %vm534_vm3, %v518_v0 }
  0xd7   : > { %v1511_v2 = vadd.f32 %v1510_v1, %v1509_v61 }
  0xd9   : > { %v489_v3 = vpop.f32.mrf.mxu0 }
  0xda   : > { %v490_v4 = vadd.f32 %v2009_v22, %v489_v3 }
  0xdc   : > { %v519_v6 = vmax.f32 %v490_v4, 0.0 }
  0xde   : > { %v1512_v7 = vsel %vm534_vm3, %v519_v6, 0.0  ;;  %1662 = vmatmul.msk.f32.gmra.mxu1 %vm534_vm3, %v519_v6 }
  0xdf   : > { %v1513_v8 = vadd.f32 %v1512_v7, %v1511_v2 }
  0xe1   : > { %v492_v9 = vpop.f32.mrf.mxu0 }
  0xe2   : > { %v493_v10 = vadd.f32 %v2009_v22, %v492_v9 }
  0xe4   : > { %v520_v11 = vmax.f32 %v493_v10, 0.0 }
  0xe6   : > { %v1514_v13 = vsel %vm534_vm3, %v520_v11, 0.0  ;;  %1663 = vmatmul.msk.f32.gmra.mxu1 %vm534_vm3, %v520_v11 }
  0xe7   : > { %v1515_v14 = vadd.f32 %v1514_v13, %v1513_v8 }
  0xe9   : > { %v495_v15 = vpop.f32.mrf.mxu0 }
  0xea   : > { %v496_v16 = vadd.f32 %v2009_v22, %v495_v15 }
  0xec   : > { %v521_v17 = vmax.f32 %v496_v16, 0.0 }
  0xee   : > { %v1516_v19 = vsel %vm534_vm3, %v521_v17, 0.0  ;;  %1664 = vmatmul.msk.f32.gmra.mxu1 %vm534_vm3, %v521_v17 }
  0xef   : > { %v1517_v21 = vadd.f32 %v1516_v19, %v1515_v14 }
  0xf1   : > { %v498_v25 = vpop.f32.mrf.mxu0 }
  0xf2   : > { %v499_v27 = vadd.f32 %v2009_v22, %v498_v25  ;;  %v525_v22 = vmax.f32 %v508_v28, 0.0  ;;  %v787_v25 = vld [vmem:[%s1956_s21] sm:$0xff] }
  0xf3   : > { %v1127_v28 = vmul.u32 2, %v787_v25  ;;  %vm823_vm5 = vcmp.gt.s32.totalorder %v787_v25, 0  ;;  %vm1023_vm9 = vcmp.ge.s32.totalorder %v787_v25, 0  ;;  %vm1335_vm14 = vcmp.ne.s32.totalorder %v787_v25, 4294967295 }
  0xf4   : > { %v522_v31 = vmax.f32 %v499_v27, 0.0  ;;  %v1524_v39 = vsel %vm534_vm3, %v525_v22, 0.0 }
  0xf6   : > { %v1518_v34 = vsel %vm534_vm3, %v522_v31, 0.0  ;;  %1665 = vmatmul.msk.f32.vlgmr.msrb.gmra.mxu3 %vm534_vm3, %v522_v31  ;;  %v2114_v31 = vld [vmem:[%s3021_s6] ss:$0 sm:$0xff] }
  0xf7   : > { %v1519_v36 = vadd.f32 %v1518_v34, %v1517_v21 }
  0xf9   : > { %v1521_v38 = vadd.f32 %v1520_v33, %v1519_v36 }
  0xfb   : > { %v1523_v40 = vadd.f32 %v1522_v37, %v1521_v38  ;;  %v2124_v38 = vld [vmem:[%s1956_s21 + $0x10] sm:$0xff] }
  0xfd   : > { %v2068_v41 = vadd.f32 %v1524_v39, %v1523_v40  ;;  %v785_v40 = vlaneseq }
  0xfe   : > { %1666 = vmatmul.msk.f32.gmra.mxu3 %vm534_vm3, %v523_v26 }
 0x106   : > { %1667 = vmatmul.msk.f32.gmra.mxu3 %vm534_vm3, %v524_v30  ;;  %v1143_v30 = vsub.s32 1, %v1127_v28 }
 0x108   : > { %v1159_v33 = vcvt.s32.f32 %v1143_v30 }
 0x10e   : > { %1668 = vmatmul.msk.f32.gmra.mxu3 %vm534_vm3, %v525_v22  ;;  %v1128_v22 = vmul.u32 2, %v2117_v32 }
 0x110   : > { %v1144_v37 = vsub.s32 1, %v1128_v22 }
 0x113   : > { %v600_v43 = vpop.f32.mrf.mxu1 }
 0x114   : > { %v601_v44 = vadd.f32 %v2076_v42, %v600_v43 }
 0x116   : > { %v648_v45 = vmax.f32 %v601_v44, 0.0  ;;  %v1160_v44 = vcvt.s32.f32 %v1144_v37 }
 0x118   : > { %1669 = vmatmul.msk.f32.vlgmr.msra.gmra.mxu2 %vm534_vm3, %v648_v45  ;;  %v2129_v45 = vand.u32 127, %v785_v40 }
 0x11a   : > { %vm819_vm4 = vcmp.lt.s32.totalorder %v2129_v45, 16  ;;  %vm820_vm6 = vcmp.ge.s32.totalorder %v2129_v45, 16  ;;  %vm821_vm7 = vcmp.lt.s32.totalorder %v2129_v45, 20 }
 0x11b   : > { %v603_v46 = vpop.f32.mrf.mxu1  ;;  %vm839_vm8 = vmand %vm823_vm5, %vm819_vm4  ;;  %vm825_vm5 = vcmp.gt.s32.totalorder %v2124_v38, 0 }
 0x11c   : > { %v604_v47 = vadd.f32 %v2076_v42, %v603_v46  ;;  %vm2148_vm11 = vmand %vm820_vm6, %vm821_vm7 }
 0x11d   : > { %vm1039_vm13 = vmand %vm1023_vm9, %vm2148_vm11  ;;  %vm1025_vm9 = vcmp.ge.s32.totalorder %v2124_v38, 0 }
 0x11e   : > { %v649_v48 = vmax.f32 %v604_v47, 0.0  ;;  %vm2159_vm15 = vmand %vm824_vm10, %vm819_vm4 }
 0x11f   : > { %vm1040_vm0 = vmand %vm1024_vm12, %vm2148_vm11 }
 0x120   : > { %1670 = vmatmul.msk.f32.gmra.mxu2 %vm534_vm3, %v649_v48  ;;  %vm2172_vm1 = vmand %vm1335_vm14, %vm2148_vm11 }
 0x121   : > { %vm2196_vm6 = vmand %vm1336_vm2, %vm2148_vm11 }
 0x122   : > { %vm1041_vm12 = vmand %vm1025_vm9, %vm2148_vm11 }
 0x123   : > { %v606_v49 = vpop.f32.mrf.mxu1 }
 0x124   : > { %v607_v50 = vadd.f32 %v2076_v42, %v606_v49  ;;  %v803_v49 = vld [vmem:[%s1951_s18] sm:$0xff] }
 0x126   : > { %v650_v51 = vmax.f32 %v607_v50, 0.0 }
 0x128   : > { %1671 = vmatmul.msk.f32.gmra.mxu2 %vm534_vm3, %v650_v51  ;;  %v2137_v51 = vld [vmem:[%s1956_s21 + $0x18] sm:$0xff] }
 0x129   : > { %vm826_vm10 = vcmp.gt.s32.totalorder %v2137_v51, 0  ;;  %vm1338_vm9 = vcmp.ne.s32.totalorder %v2137_v51, 4294967295 }
 0x12b   : > { %v609_v52 = vpop.f32.mrf.mxu1 }
 0x12c   : > { %v610_v53 = vadd.f32 %v2076_v42, %v609_v52 }
 0x12e   : > { %v651_v54 = vmax.f32 %v610_v53, 0.0 }
 0x130   : > { %1672 = vmatmul.msk.f32.gmra.mxu2 %vm534_vm3, %v651_v54 }
 0x133   : > { %v612_v55 = vpop.f32.mrf.mxu1 }
 0x134   : > { %v613_v56 = vadd.f32 %v2076_v42, %v612_v55 }
 0x136   : > { %v652_v57 = vmax.f32 %v613_v56, 0.0 }
 0x138   : > { %1673 = vmatmul.msk.f32.gmra.mxu2 %vm534_vm3, %v652_v57  ;;  %v1130_v57 = vmul.u32 2, %v2137_v51 }
 0x13b   : > { %v615_v58 = vpop.f32.mrf.mxu1 }
 0x13c   : > { %v616_v59 = vadd.f32 %v2076_v42, %v615_v58 }
 0x13e   : > { %v653_v60 = vmax.f32 %v616_v59, 0.0  ;;  %v804_v59 = vld [vmem:[%s1951_s18 + $0x8] sm:$0xff] }
 0x140   : > { %1674 = vmatmul.msk.f32.gmra.mxu2 %vm534_vm3, %v653_v60 }
 0x143   : > { %v618_v61 = vpop.f32.mrf.mxu1 }
 0x144   : > { %v619_v62 = vadd.f32 %v2076_v42, %v618_v61 }
 0x146   : > { %v654_v63 = vmax.f32 %v619_v62, 0.0 }
 0x148   : > { %1675 = vmatmul.msk.f32.gmra.mxu2 %vm534_vm3, %v654_v63 }
 0x14b   : > { %v621_v0 = vpop.f32.mrf.mxu1 }
 0x14c   : > { %v622_v1 = vadd.f32 %v2076_v42, %v621_v0  ;;  %v1146_v0 = vsub.s32 1, %v1130_v57 }
 0x14e   : > { %v655_v2 = vmax.f32 %v622_v1, 0.0 }
 0x150   : > { %1676 = vmatmul.msk.f32.gmra.mxu2 %vm534_vm3, %v655_v2 }
 0x153   : > { %v624_v3 = vpop.f32.mrf.mxu1 }
 0x154   : > { %v625_v4 = vadd.f32 %v2076_v42, %v624_v3 }
 0x156   : > { %v656_v5 = vmax.f32 %v625_v4, 0.0  ;;  %v2165_v4 = vld [vmem:[%s1956_s21 + $0x20] sm:$0xff] }
 0x157   : > { %vm827_vm2 = vcmp.gt.s32.totalorder %v2165_v4, 0 }
 0x158   : > { %1677 = vmatmul.msk.f32.gmra.mxu2 %vm534_vm3, %v656_v5 }
 0x15b   : > { %v627_v6 = vpop.f32.mrf.mxu1 }
 0x15c   : > { %v628_v7 = vadd.f32 %v2076_v42, %v627_v6 }
 0x15e   : > { %v657_v8 = vmax.f32 %v628_v7, 0.0  ;;  %v1880_v7 = vmov 0.0  }
 0x15f   : > { %v1718_v30 = vsel %vm2196_vm6, 1.0, %v1880_v7 }
 0x160   : > { %1678 = vmatmul.msk.f32.gmra.mxu2 %vm534_vm3, %v657_v8  ;;  %v1701_v8 = vsel %vm1039_vm13, 1.0, %v1880_v7  ;;  %vm1337_vm13 = vcmp.ne.s32.totalorder %v2124_v38, 4294967295 }
 0x161   : > { %v1087_v22 = vsel %vm534_vm3, %v1701_v8, 0.0 }
 0x163   : > { %v630_v9 = vpop.f32.mrf.mxu1 }
 0x164   : > { %v631_v10 = vadd.f32 %v2076_v42, %v630_v9 }
 0x166   : > { %v658_v11 = vmax.f32 %v631_v10, 0.0  ;;  %v805_v10 = vld [vmem:[%s1951_s18 + $0x10] sm:$0xff] }
 0x168   : > { %1679 = vmatmul.msk.f32.gmra.mxu2 %vm534_vm3, %v658_v11  ;;  %v2180_v11 = vld [vmem:[%s1956_s21 + $0x28] sm:$0xff] }
 0x16b   : > { %v633_v12 = vpop.f32.mrf.mxu1 }
 0x16c   : > { %v634_v13 = vadd.f32 %v2076_v42, %v633_v12 }
 0x16e   : > { %v659_v14 = vmax.f32 %v634_v13, 0.0  ;;  %v1717_v13 = vsel %vm2172_vm1, 1.0, %v1880_v7 }
 0x170   : > { %1680 = vmatmul.msk.f32.gmra.mxu2 %vm534_vm3, %v659_v14 }
 0x179   : > { %v636_v15 = vpop.f32.mrf.mxu3 }
 0x17a   : > { %v637_v16 = vadd.f32 %v2076_v42, %v636_v15 }
 0x17c   : > { %v660_v17 = vmax.f32 %v637_v16, 0.0  ;;  %v1162_v16 = vcvt.s32.f32 %v1146_v0 }
 0x17e   : > { %1681 = vmatmul.msk.f32.vlgmr.msra.gmra.mxu3 %vm534_vm3, %v660_v17  ;;  %v1131_v17 = vmul.u32 2, %v2165_v4 }
 0x181   : > { %v639_v18 = vpop.f32.mrf.mxu3 }
 0x182   : > { %v640_v19 = vadd.f32 %v2076_v42, %v639_v18 }
 0x184   : > { %v661_v20 = vmax.f32 %v640_v19, 0.0  ;;  %v1702_v19 = vsel %vm1040_vm0, 1.0, %v1880_v7  ;;  %vm2243_vm0 = vmand %vm1337_vm13, %vm2148_vm11 }
 0x185   : > { %v1719_v8 = vsel %vm2243_vm0, 1.0, %v1880_v7  ;;  %vm2308_vm13 = vmand %vm827_vm2, %vm819_vm4  ;;  %vm1339_vm2 = vcmp.ne.s32.totalorder %v2165_v4, 4294967295 }
 0x186   : > { %1682 = vmatmul.msk.f32.gmra.mxu3 %vm534_vm3, %v661_v20 }
 0x189   : > { %v642_v21 = vpop.f32.mrf.mxu3 }
 0x18a   : > { %v643_v23 = vadd.f32 %v2076_v42, %v642_v21 }
 0x18c   : > { %v662_v24 = vmax.f32 %v643_v23, 0.0 }
 0x18e   : > { %1683 = vmatmul.msk.f32.gmra.mxu3 %vm534_vm3, %v662_v24 }
 0x191   : > { %v645_v26 = vpop.f32.mrf.mxu3 }
 0x192   : > { %v646_v27 = vadd.f32 %v2076_v42, %v645_v26  ;;  %v1129_v42 = vmul.u32 2, %v2124_v38 }
 0x194   : > { %v663_v29 = vmax.f32 %v646_v27, 0.0  ;;  %v1145_v48 = vsub.s32 1, %v1129_v42  ;;  %v1132_v27 = vmul.u32 2, %v2180_v11  ;;  %v1088_v42 = vsel %vm534_vm3, %v1702_v19, 0.0  ;;  %v808_v19 = vld [vmem:[%s1951_s18 + $0x28] sm:$0xff] }
 0x196   : > { %1684 = vmatmul.msk.f32.gmra.mxu3 %vm534_vm3, %v663_v29  ;;  %v1161_v54 = vcvt.s32.f32 %v1145_v48 }
 0x19b   : > { %v737_v34 = vpop.f32.mrf.mxu2 }
 0x19c   : > { %v738_v35 = vadd.f32 %v2114_v31, %v737_v34 }
 0x19e   : > { %v2121_v36 = vmul.f32 %v1159_v33, %v738_v35  ;;  %v855_v53 = vsub.f32 %v738_v35, %v803_v49  ;;  %v1455_v35 = vsel %vm534_vm3, %v1717_v13, 0.0 }
 0x1a0   : > { %v1207_v39 = vand.u32 2147483647, %v2121_v36  ;;  %v871_v61 = vsel %vm839_vm8, %v855_v53, 0.0  ;;  %vm841_vm8 = vmand %vm825_vm5, %vm819_vm4 }
 0x1a1   : > { %v887_v5 = vand.u32 2147483647, %v871_v61  ;;  %v919_v6 = vmul.f32 4.5, %v871_v61 }
 0x1a2   : > { %v1223_v47 = vsub.f32 0.0, %v1207_v39 }
 0x1a3   : > { %v740_v43 = vpop.f32.mrf.mxu2  ;;  %v935_v23 = vmul.f32 %v919_v6, %v871_v61  ;;  %v1685_v24 = vadd.f32 -0.055555556, %v887_v5  ;;  %vm2201_vm7 = vcmp.lt.f32.partialorder %v887_v5, 0.11111111  ;;  %v1703_v61 = vsel %vm1041_vm12, 1.0, %v1880_v7 }
 0x1a4   : > { %v741_v46 = vadd.f32 %v2114_v31, %v740_v43  ;;  %v1239_v52 = vmul.f32 1.442695, %v1223_v47  ;;  %v2228_v47 = vsub.s32 1, %v1132_v27  ;;  %v1458_v27 = vsel %vm534_vm3, %v1719_v8, 0.0 }
 0x1a5   : > { %v967_v39 = vsel %vm2201_vm7, %v935_v23, %v1685_v24  ;;  %vm828_vm12 = vcmp.gt.s32.totalorder %v2180_v11, 0 }
 0x1a6   : > { %v2133_v50 = vmul.f32 %v1160_v44, %v741_v46  ;;  %1774 = vpow2.f32 %v1239_v52  ;;  %v856_v2 = vsub.f32 %v741_v46, %v804_v59  ;;  %v1147_v44 = vsub.s32 1, %v1131_v17 }
 0x1a7   : > { %v1456_v46 = vsel %vm534_vm3, %v1718_v30, 0.0  ;;  %v1089_v59 = vadd.f32 %v1088_v42, %v1087_v22  ;;  %v983_v0 = vsel %vm534_vm3, %v967_v39, 0.0  ;;  %v1090_v17 = vsel %vm534_vm3, %v1703_v61, 0.0 }
 0x1a8   : > { %v1208_v55 = vand.u32 2147483647, %v2133_v50  ;;  %v872_v18 = vsel %vm2159_vm15, %v856_v2, 0.0  ;;  %vm1026_vm15 = vcmp.ge.s32.totalorder %v2137_v51, 0  ;;  %v1457_v1 = vadd.f32 %v1456_v46, %v1455_v35 }
 0x1a9   : > { %v888_v32 = vand.u32 2147483647, %v872_v18  ;;  %v920_v33 = vmul.f32 4.5, %v872_v18  ;;  %vm2262_vm5 = vmand %vm1026_vm15, %vm2148_vm11 }
 0x1aa   : > { %v1224_v63 = vsub.f32 0.0, %v1208_v55 }
 0x1ab   : > { %v743_v56 = vpop.f32.mrf.mxu2  ;;  %vm2230_vm14 = vcmp.lt.f32.partialorder %v888_v32, 0.11111111  ;;  %v936_v49 = vmul.f32 %v920_v33, %v872_v18  ;;  %v1686_v52 = vadd.f32 -0.055555556, %v888_v32  ;;  %v1192_v18 = vmax.f32 %v2133_v50, 0.0 }
 0x1ac   : > { %v744_v58 = vadd.f32 %v2114_v31, %v743_v56  ;;  %v1775_v12 = vpop.eup %1774  ;;  %v1241_v14 = vmul.f32 1.442695, %v1224_v63  ;;  %v1163_v63 = vcvt.s32.f32 %v1147_v44  ;;  %v1091_v33 = vadd.f32 %v1090_v17, %v1089_v59 }
 0x1ad   : > { %v1271_v29 = vadd.f32 1.0, %v1775_v12  ;;  %v968_v6 = vsel %vm2230_vm14, %v936_v49, %v1686_v52  ;;  %v1164_v12 = vcvt.s32.f32 %v2228_v47  ;;  %vm2315_vm14 = vmand %vm1338_vm9, %vm2148_vm11 }
 0x1ae   : > { %v2153_v62 = vmul.f32 %v1161_v54, %v744_v58  ;;  %v857_v26 = vsub.f32 %v744_v58, %v805_v10  ;;  %1776 = vpow2.f32 %v1241_v14  ;;  %v1191_v58 = vmax.f32 %v2121_v36, 0.0  ;;  %v2251_v36 = vld [vmem:[%s1956_s21 + $0x30] sm:$0xff]  ;;  %vm2378_vm9 = vmand %vm1339_vm2, %vm2148_vm11 }
 0x1af   : > { %1778 = vlog2.f32 %v1271_v29  ;;  %v1133_v23 = vmul.u32 2, %v2251_v36  ;;  %v1704_v29 = vsel %vm2262_vm5, 1.0, %v1880_v7  ;;  %vm1029_vm2 = vcmp.ge.s32.totalorder %v2251_v36, 0 }
 0x1b0   : > { %v1209_v3 = vand.u32 2147483647, %v2153_v62  ;;  %v873_v43 = vsel %vm841_vm8, %v857_v26, 0.0  ;;  %v984_v26 = vsel %vm534_vm3, %v968_v6, 0.0  ;;  %vm2281_vm8 = vmand %vm826_vm10, %vm819_vm4  ;;  %vm1027_vm10 = vcmp.ge.s32.totalorder %v2165_v4, 0 }
 0x1b1   : > { %v889_v55 = vand.u32 2147483647, %v873_v43  ;;  %v921_v56 = vmul.f32 4.5, %v873_v43  ;;  %v1149_v47 = vsub.s32 1, %v1133_v23  ;;  %v1092_v48 = vsel %vm534_vm3, %v1704_v29, 0.0  ;;  %vm1043_vm15 = vmand %vm1027_vm10, %vm2148_vm11 }
 0x1b2   : > { %v1225_v20 = vsub.f32 0.0, %v1209_v3  ;;  %v806_v3 = vld [vmem:[%s1951_s18 + $0x18] sm:$0xff]  ;;  %v1705_v8 = vsel %vm1043_vm15, 1.0, %v1880_v7 }
 0x1b3   : > { %v746_v15 = vpop.f32.mrf.mxu2  ;;  %vm2269_vm7 = vcmp.lt.f32.partialorder %v889_v55, 0.11111111  ;;  %v1094_v28 = vsel %vm534_vm3, %v1705_v8, 0.0 }
 0x1b4   : > { %v2190_v21 = vadd.f32 %v2114_v31, %v746_v15  ;;  %v1243_v37 = vmul.f32 1.442695, %v1225_v20  ;;  %v1777_v57 = vpop.eup %1776  ;;  %v937_v15 = vmul.f32 %v921_v56, %v873_v43  ;;  %v985_v43 = vadd.f32 %v984_v26, %v983_v0 }
 0x1b5   : > { %v1779_v13 = vpop.eup %1778  ;;  %v1272_v14 = vadd.f32 1.0, %v1777_v57  ;;  %v1459_v57 = vadd.f32 %v1458_v27, %v1457_v1  ;;  %v1093_v1 = vadd.f32 %v1092_v48, %v1091_v33 }
 0x1b6   : > { %v2214_v34 = vmul.f32 %v1162_v16, %v2190_v21  ;;  %1780 = vpow2.f32 %v1243_v37  ;;  %v1687_v16 = vadd.f32 -0.055555556, %v889_v55  ;;  %v858_v20 = vsub.f32 %v2190_v21, %v806_v3  ;;  %v807_v21 = vld [vmem:[%s1951_s18 + $0x20] sm:$0xff]  ;;  %v2293_v37 = vld [vmem:[%s1956_s21 + $0x38] sm:$0xff] }
 0x1b7   : > { %v1288_v32 = vmul.f32 0.6931472, %v1779_v13  ;;  %1782 = vlog2.f32 %v1272_v14  ;;  %v1165_v3 = vcvt.s32.f32 %v1149_v47  ;;  %v2372_v47 = vadd.f32 %v1094_v28, %v1093_v1 }
 0x1b8   : > { %v1210_v53 = vand.u32 2147483647, %v2214_v34  ;;  %v969_v39 = vsel %vm2269_vm7, %v937_v15, %v1687_v16  ;;  %v874_v46 = vsel %vm2281_vm8, %v858_v20, 0.0  ;;  %v1194_v29 = vmax.f32 %v2214_v34, 0.0 }
 0x1b9   : > { %v1319_v55 = vadd.f32 %v1288_v32, %v1191_v58  ;;  %v986_v56 = vsel %vm534_vm3, %v969_v39, 0.0  ;;  %v890_v59 = vand.u32 2147483647, %v874_v46  ;;  %v922_v61 = vmul.f32 4.5, %v874_v46 }
 0x1ba   : > { %v1226_v10 = vsub.f32 0.0, %v1210_v53  ;;  %v1193_v58 = vmax.f32 %v2153_v62, 0.0  ;;  %vm1028_vm7 = vcmp.ge.s32.totalorder %v2180_v11, 0  ;;  %vm829_vm8 = vcmp.gt.s32.totalorder %v2251_v36, 0 }
 0x1bb   : > { %v749_v54 = vpop.f32.mrf.mxu2  ;;  %v1367_v13 = vsel %vm2172_vm1, %v1319_v55, 0.0  ;;  %v938_v16 = vmul.f32 %v922_v61, %v874_v46  ;;  %v1688_v17 = vadd.f32 -0.055555556, %v890_v59  ;;  %vm2347_vm5 = vcmp.lt.f32.partialorder %v890_v59, 0.11111111  ;;  %vm2360_vm1 = vmand %vm828_vm12, %vm819_vm4 }
 0x1bc   : > { %v750_v5 = vadd.f32 %v2114_v31, %v749_v54  ;;  %v1781_v24 = vpop.eup %1780  ;;  %v1245_v22 = vmul.f32 1.442695, %v1226_v10  ;;  %v1134_v54 = vmul.u32 2, %v2293_v37  ;;  %v1721_v55 = vsel %vm2378_vm9, 1.0, %v1880_v7  ;;  %vm1044_vm10 = vmand %vm1028_vm7, %vm2148_vm11 }
 0x1bd   : > { %v1273_v44 = vadd.f32 1.0, %v1781_v24  ;;  %v970_v46 = vsel %vm2347_vm5, %v938_v16, %v1688_v17  ;;  %v809_v17 = vld [vmem:[%s1951_s18 + $0x30] sm:$0xff]  ;;  %vm830_vm15 = vcmp.gt.s32.totalorder %v2293_v37, 0  ;;  %vm845_vm5 = vmand %vm829_vm8, %vm819_vm4  ;;  %vm1341_vm7 = vcmp.ne.s32.totalorder %v2251_v36, 4294967295 }
 0x1be   : > { %v2289_v30 = vmul.f32 %v1163_v63, %v750_v5  ;;  %v859_v52 = vsub.f32 %v750_v5, %v807_v21  ;;  %1784 = vpow2.f32 %v1245_v22  ;;  %v1720_v63 = vsel %vm2315_vm14, 1.0, %v1880_v7  ;;  %v1783_v5 = vpop.eup %1782 }
 0x1bf   : > { %1786 = vlog2.f32 %v1273_v44  ;;  %v2336_v10 = vsub.s32 1, %v1134_v54  ;;  %v1460_v14 = vsel %vm534_vm3, %v1720_v63, 0.0  ;;  %v1290_v26 = vmul.f32 0.6931472, %v1783_v5 }
 0x1c0   : > { %v1211_v53 = vand.u32 2147483647, %v2289_v30  ;;  %v875_v6 = vsel %vm2308_vm13, %v859_v52, 0.0  ;;  %v1461_v21 = vadd.f32 %v1460_v14, %v1459_v57  ;;  %v2383_v52 = vld [vmem:[%s1956_s21 + $0x40] sm:$0xff]  ;;  %v988_v50 = vsel %vm534_vm3, %v970_v46, 0.0 }
 0x1c1   : > { %v923_v9 = vmul.f32 4.5, %v875_v6  ;;  %v891_v32 = vand.u32 2147483647, %v875_v6  ;;  %v1135_v1 = vmul.u32 2, %v2383_v52  ;;  %vm1340_vm13 = vcmp.ne.s32.totalorder %v2180_v11, 4294967295 }
 0x1c2   : > { %v1227_v38 = vsub.f32 0.0, %v1211_v53  ;;  %v1320_v53 = vadd.f32 %v1290_v26, %v1192_v18  ;;  %vm831_vm8 = vcmp.gt.s32.totalorder %v2383_v52, 0 }
 0x1c3   : > { %v752_v35 = vpop.f32.mrf.mxu2  ;;  %v939_v54 = vmul.f32 %v923_v9, %v875_v6  ;;  %v1689_v59 = vadd.f32 -0.055555556, %v891_v32  ;;  %vm2397_vm12 = vcmp.lt.f32.partialorder %v891_v32, 0.11111111 }
 0x1c4   : > { %v2299_v42 = vadd.f32 %v2114_v31, %v752_v35  ;;  %v1785_v24 = vpop.eup %1784  ;;  %v1247_v33 = vmul.f32 1.442695, %v1227_v38  ;;  %v2354_v35 = vsel %vm534_vm3, %v1367_v13, 0.0  ;;  %v1368_v8 = vsel %vm2196_vm6, %v1320_v53, 0.0  ;;  %vm2429_vm6 = vmand %vm1340_vm13, %vm2148_vm11 }
 0x1c5   : > { %v1787_v22 = vpop.eup %1786  ;;  %v1274_v51 = vadd.f32 1.0, %v1785_v24  ;;  %v1706_v38 = vsel %vm1044_vm10, 1.0, %v1880_v7  ;;  %v971_v14 = vsel %vm2397_vm12, %v939_v54, %v1689_v59  ;;  %v1151_v24 = vsub.s32 1, %v1135_v1  ;;  %vm2475_vm10 = vmand %vm1341_vm7, %vm2148_vm11 }
 0x1c6   : > { %v2330_v0 = vmul.f32 %v1164_v12, %v2299_v42  ;;  %v987_v12 = vadd.f32 %v986_v56, %v985_v43  ;;  %v860_v43 = vsub.f32 %v2299_v42, %v808_v19  ;;  %v1166_v56 = vcvt.s32.f32 %v2336_v10  ;;  %vm2499_vm13 = vmand %vm830_vm15, %vm819_vm4 }
 0x1c7   : > { %v1292_v57 = vmul.f32 0.6931472, %v1787_v22  ;;  %1788 = vpow2.f32 %v1247_v33  ;;  %v1384_v27 = vsel %vm534_vm3, %v1368_v8, 0.0  ;;  %v990_v9 = vsel %vm534_vm3, %v971_v14, 0.0 }
 0x1c8   : > { %v1212_v20 = vand.u32 2147483647, %v2330_v0  ;;  %v876_v61 = vsel %vm2360_vm1, %v860_v43, 0.0  ;;  %1790 = vlog2.f32 %v1274_v51  ;;  %v989_v19 = vadd.f32 %v988_v50, %v987_v12 }
 0x1c9   : > { %v1321_v13 = vadd.f32 %v1292_v57, %v1193_v58  ;;  %v924_v16 = vmul.f32 4.5, %v876_v61  ;;  %v1096_v58 = vsel %vm534_vm3, %v1706_v38, 0.0  ;;  %v1722_v43 = vsel %vm2429_vm6, 1.0, %v1880_v7 }
 0x1ca   : > { %v1228_v42 = vsub.f32 0.0, %v1212_v20  ;;  %v1195_v20 = vmax.f32 %v2289_v30, 0.0  ;;  %v1167_v51 = vcvt.s32.f32 %v1151_v24  ;;  %v2450_v53 = vadd.f32 %v990_v9, %v989_v19 }
 0x1cb   : > { %v755_v15 = vpop.f32.mrf.mxu2  ;;  %v940_v22 = vmul.f32 %v924_v16, %v876_v61  ;;  %v1196_v50 = vmax.f32 %v2330_v0, 0.0  ;;  %v1464_v18 = vsel %vm534_vm3, %v1722_v43, 0.0  ;;  %v1723_v38 = vsel %vm2475_vm10, 1.0, %v1880_v7 }
 0x1cc   : > { %v2345_v23 = vadd.f32 %v2114_v31, %v755_v15  ;;  %v1249_v5 = vmul.f32 1.442695, %v1228_v42  ;;  %v892_v15 = vand.u32 2147483647, %v876_v61  ;;  %v1385_v42 = vadd.f32 %v1384_v27, %v2354_v35  ;;  %v810_v61 = vld [vmem:[%s1951_s18 + $0x38] sm:$0xff] }
 0x1cd   : > { %v1789_v26 = vpop.eup %1788  ;;  %vm1030_vm12 = vcmp.ge.s32.totalorder %v2293_v37, 0 }
 0x1ce   : > { %v2368_v44 = vmul.f32 %v1165_v3, %v2345_v23  ;;  %v1462_v3 = vsel %vm534_vm3, %v1721_v55, 0.0  ;;  %1792 = vpow2.f32 %v1249_v5  ;;  %v861_v28 = vsub.f32 %v2345_v23, %v809_v17  ;;  %v1791_v33 = vpop.eup %1790 }
 0x1cf   : > { %v1463_v62 = vadd.f32 %v1462_v3, %v1461_v21  ;;  %v1369_v21 = vsel %vm2243_vm0, %v1321_v13, 0.0  ;;  %v1690_v39 = vadd.f32 -0.055555556, %v892_v15  ;;  %v1275_v11 = vadd.f32 1.0, %v1789_v26  ;;  %vm1045_vm0 = vmand %vm1029_vm2, %vm2148_vm11 }
 0x1d0   : > { %v1213_v4 = vand.u32 2147483647, %v2368_v44  ;;  %vm2444_vm1 = vcmp.lt.f32.partialorder %v892_v15, 0.11111111  ;;  %v1294_v55 = vmul.f32 0.6931472, %v1791_v33 }
 0x1d1   : > { %v877_v57 = vsel %vm845_vm5, %v861_v28, 0.0  ;;  %v1386_v59 = vsel %vm534_vm3, %v1369_v21, 0.0  ;;  %v1465_v17 = vadd.f32 %v1464_v18, %v1463_v62  ;;  %vm1342_vm2 = vcmp.ne.s32.totalorder %v2293_v37, 4294967295  ;;  %vm2509_vm5 = vmand %vm1030_vm12, %vm2148_vm11  ;;  %v811_v62 = vld [vmem:[%s1951_s18 + $0x40] sm:$0xff] }
 0x1d2   : > { %v1229_v10 = vsub.f32 0.0, %v1213_v4  ;;  %v972_v4 = vsel %vm2444_vm1, %v940_v22, %v1690_v39  ;;  %v893_v5 = vand.u32 2147483647, %v877_v57  ;;  %v925_v8 = vmul.f32 4.5, %v877_v57  ;;  %v2520_v22 = vld [vmem:[%s1956_s21 + $0x50] sm:$0xff]  ;;  %vm2530_vm1 = vmand %vm1342_vm2, %vm2148_vm11 }
 0x1d3   : > { %v758_v63 = vpop.f32.mrf.mxu2  ;;  %v2489_v36 = vadd.f32 %v1386_v59, %v1385_v42  ;;  %v1322_v13 = vadd.f32 %v1294_v55, %v1194_v29  ;;  %v992_v16 = vsel %vm534_vm3, %v972_v4, 0.0  ;;  %v1724_v49 = vsel %vm2530_vm1, 1.0, %v1880_v7 }
 0x1d4   : > { %v2406_v6 = vadd.f32 %v2114_v31, %v758_v63  ;;  %v1251_v32 = vmul.f32 1.442695, %v1229_v10  ;;  %v1793_v35 = vpop.eup %1792  ;;  %v2487_v10 = vld [vmem:[%s1956_s21 + $0x48] sm:$0xff]  ;;  %vm2515_vm15 = vcmp.lt.f32.partialorder %v893_v5, 0.11111111  ;;  %vm1343_vm12 = vcmp.ne.s32.totalorder %v2383_v52, 4294967295 }
 0x1d5   : > { %v1276_v14 = vadd.f32 1.0, %v1793_v35  ;;  %v1136_v9 = vmul.u32 2, %v2487_v10  ;;  %v1691_v33 = vadd.f32 -0.055555556, %v893_v5  ;;  %v1370_v43 = vsel %vm2315_vm14, %v1322_v13, 0.0  ;;  %vm847_vm14 = vmand %vm831_vm8, %vm819_vm4 }
 0x1d6   : > { %v2420_v25 = vmul.f32 %v1166_v56, %v2406_v6  ;;  %v2461_v56 = vadd.f32 %v1096_v58, %v2372_v47  ;;  %1794 = vpow2.f32 %v1251_v32  ;;  %v1707_v47 = vsel %vm1045_vm0, 1.0, %v1880_v7 }
 0x1d7   : > { %1796 = vlog2.f32 %v1275_v11  ;;  %v862_v15 = vsub.f32 %v2406_v6, %v810_v61  ;;  %v1098_v24 = vsel %vm534_vm3, %v1707_v47, 0.0  ;;  %v1466_v6 = vsel %vm534_vm3, %v1723_v38, 0.0 }
 0x1d8   : > { %v1214_v46 = vand.u32 2147483647, %v2420_v25  ;;  %v941_v32 = vmul.f32 %v925_v8, %v877_v57  ;;  %1798 = vlog2.f32 %v1276_v14  ;;  %v1137_v57 = vmul.u32 2, %v2520_v22 }
 0x1d9   : > { %v878_v11 = vsel %vm2499_vm13, %v862_v15, 0.0  ;;  %v993_v61 = vadd.f32 %v992_v16, %v2450_v53  ;;  %v1197_v47 = vmax.f32 %v2368_v44, 0.0  ;;  %v1388_v5 = vsel %vm534_vm3, %v1370_v43, 0.0  ;;  %v2582_v43 = vld [vmem:[%s1956_s21 + $0x58] sm:$0xff] }
 0x1da   : > { %v1230_v1 = vsub.f32 0.0, %v1214_v46  ;;  %v1152_v46 = vsub.s32 1, %v1136_v9  ;;  %v973_v59 = vsel %vm2515_vm15, %v941_v32, %v1691_v33  ;;  %v894_v4 = vand.u32 2147483647, %v878_v11 }
 0x1db   : > { %v761_v2 = vpop.f32.mrf.mxu2  ;;  %v1153_v38 = vsub.s32 1, %v1137_v57  ;;  %v994_v14 = vsel %vm534_vm3, %v973_v59, 0.0  ;;  %v1468_v53 = vsel %vm534_vm3, %v1724_v49, 0.0  ;;  %vm832_vm7 = vcmp.gt.s32.totalorder %v2487_v10, 0 }
 0x1dc   : > { %v2458_v54 = vadd.f32 %v2114_v31, %v761_v2  ;;  %v1795_v29 = vpop.eup %1794  ;;  %v1253_v27 = vmul.f32 1.442695, %v1230_v1  ;;  %v1168_v55 = vcvt.s32.f32 %v1152_v46  ;;  %v1467_v1 = vadd.f32 %v1466_v6, %v1465_v17  ;;  %vm848_vm13 = vmand %vm832_vm7, %vm819_vm4 }
 0x1dd   : > { %v1797_v39 = vpop.eup %1796  ;;  %v1277_v2 = vadd.f32 1.0, %v1795_v29  ;;  %vm2564_vm0 = vcmp.lt.f32.partialorder %v894_v4, 0.11111111  ;;  %v2574_v30 = vadd.f32 %v1098_v24, %v2461_v56  ;;  %v1389_v32 = vadd.f32 %v1388_v5, %v2489_v36 }
 0x1de   : > { %v2480_v3 = vmul.f32 %v1167_v51, %v2458_v54  ;;  %v1708_v51 = vsel %vm2509_vm5, 1.0, %v1880_v7  ;;  %1800 = vpow2.f32 %v1253_v27  ;;  %v863_v37 = vsub.f32 %v2458_v54, %v811_v62  ;;  %v1799_v13 = vpop.eup %1798  ;;  %v812_v62 = vld [vmem:[%s1951_s18 + $0x48] sm:$0xff] }
 0x1df   : > { %v1296_v35 = vmul.f32 0.6931472, %v1797_v39  ;;  %v926_v54 = vmul.f32 4.5, %v878_v11  ;;  %1802 = vlog2.f32 %v1277_v2  ;;  %v2559_v15 = vsel %vm534_vm3, %v1708_v51, 0.0 }
 0x1e0   : > { %v1215_v34 = vand.u32 2147483647, %v2480_v3  ;;  %v879_v16 = vsel %vm847_vm14, %v863_v37, 0.0  ;;  %v1692_v27 = vadd.f32 -0.055555556, %v894_v4  ;;  %v995_v33 = vadd.f32 %v994_v14, %v993_v61  ;;  %v2619_v14 = vld [vmem:[%s1956_s21 + $0x60] sm:$0xff] }
 0x1e1   : > { %v1323_v17 = vadd.f32 %v1296_v35, %v1195_v20  ;;  %v942_v26 = vmul.f32 %v926_v54, %v878_v11  ;;  %v1298_v9 = vmul.f32 0.6931472, %v1799_v13  ;;  %v895_v20 = vand.u32 2147483647, %v879_v16 }
 0x1e2   : > { %v1231_v21 = vsub.f32 0.0, %v1215_v34  ;;  %v1198_v46 = vmax.f32 %v2420_v25, 0.0  ;;  %v1469_v51 = vadd.f32 %v1468_v53, %v1467_v1  ;;  %vm1031_vm8 = vcmp.ge.s32.totalorder %v2383_v52, 0 }
 0x1e3   : > { %v764_v58 = vpop.f32.mrf.mxu2  ;;  %v1371_v24 = vsel %vm2378_vm9, %v1323_v17, 0.0  ;;  %v974_v36 = vsel %vm2564_vm0, %v942_v26, %v1692_v27  ;;  %v1324_v37 = vadd.f32 %v1298_v9, %v1196_v50  ;;  %vm2598_vm2 = vcmp.lt.f32.partialorder %v895_v20, 0.11111111  ;;  %vm2606_vm9 = vmand %vm1343_vm12, %vm2148_vm11 }
 0x1e4   : > { %v2541_v42 = vadd.f32 %v2114_v31, %v764_v58  ;;  %v1255_v18 = vmul.f32 1.442695, %v1231_v21  ;;  %v1801_v6 = vpop.eup %1800  ;;  %v1169_v58 = vcvt.s32.f32 %v1153_v38  ;;  %v927_v21 = vmul.f32 4.5, %v879_v16  ;;  %vm1047_vm5 = vmand %vm1031_vm8, %vm2148_vm11 }
 0x1e5   : > { %v1803_v11 = vpop.eup %1802  ;;  %v1278_v2 = vadd.f32 1.0, %v1801_v6  ;;  %v1693_v59 = vadd.f32 -0.055555556, %v895_v20  ;;  %v1390_v54 = vsel %vm534_vm3, %v1371_v24, 0.0  ;;  %v996_v5 = vsel %vm534_vm3, %v974_v36, 0.0  ;;  %v813_v6 = vld [vmem:[%s1951_s18 + $0x50] sm:$0xff] }
 0x1e6   : > { %v2555_v8 = vmul.f32 %v1168_v55, %v2541_v42  ;;  %1804 = vpow2.f32 %v1255_v18  ;;  %v864_v56 = vsub.f32 %v2541_v42, %v812_v62  ;;  %v1138_v55 = vmul.u32 2, %v2582_v43 }
 0x1e7   : > { %v1300_v57 = vmul.f32 0.6931472, %v1803_v11  ;;  %v943_v35 = vmul.f32 %v927_v21, %v879_v16  ;;  %1806 = vlog2.f32 %v1278_v2  ;;  %v1725_v13 = vsel %vm2606_vm9, 1.0, %v1880_v7 }
 0x1e8   : > { %v1216_v28 = vand.u32 2147483647, %v2555_v8  ;;  %v880_v50 = vsel %vm848_vm13, %v864_v56, 0.0  ;;  %v1154_v1 = vsub.s32 1, %v1138_v55  ;;  %v1372_v53 = vsel %vm2429_vm6, %v1324_v37, 0.0 }
 0x1e9   : > { %vm1344_vm15 = vcmp.ne.s32.totalorder %v2487_v10, 4294967295  ;;  %v975_v17 = vsel %vm2598_vm2, %v943_v35, %v1693_v59  ;;  %v896_v34 = vand.u32 2147483647, %v880_v50  ;;  %vm833_vm14 = vcmp.gt.s32.totalorder %v2520_v22, 0 }
 0x1ea   : > { %v1232_v48 = vsub.f32 0.0, %v1216_v28  ;;  %v1325_v12 = vadd.f32 %v1300_v57, %v1197_v47  ;;  %v928_v27 = vmul.f32 4.5, %v880_v50  ;;  %v1139_v52 = vmul.u32 2, %v2619_v14  ;;  %vm2646_vm6 = vmand %vm1344_vm15, %vm2148_vm11  ;;  %v2669_v57 = vld [vmem:[%s1956_s21 + $0x68] sm:$0xff] }
 0x1eb   : > { %v767_v19 = vpop.f32.mrf.mxu2  ;;  %v997_v9 = vadd.f32 %v996_v5, %v995_v33  ;;  %v2639_v20 = vsel %vm1047_vm5, 1.0, %v1880_v7  ;;  %v1470_v21 = vsel %vm534_vm3, %v1725_v13, 0.0  ;;  %v1392_v33 = vsel %vm534_vm3, %v1372_v53, 0.0  ;;  %vm849_vm0 = vmand %vm833_vm14, %vm819_vm4 }
 0x1ec   : > { %v2569_v29 = vadd.f32 %v2114_v31, %v767_v19  ;;  %v1805_v49 = vpop.eup %1804  ;;  %v1257_v16 = vmul.f32 1.442695, %v1232_v48  ;;  %v1170_v19 = vcvt.s32.f32 %v1154_v1  ;;  %v998_v11 = vsel %vm534_vm3, %v975_v17, 0.0 }
 0x1ed   : > { %v1279_v38 = vadd.f32 1.0, %v1805_v49  ;;  %v1807_v28 = vpop.eup %1806  ;;  %v1726_v2 = vsel %vm2646_vm6, 1.0, %v1880_v7  ;;  %v1373_v24 = vsel %vm2475_vm10, %v1325_v12, 0.0  ;;  %v1694_v36 = vadd.f32 -0.055555556, %v896_v34 }
 0x1ee   : > { %v2579_v39 = vmul.f32 %v1169_v58, %v2569_v29  ;;  %v1391_v58 = vadd.f32 %v1390_v54, %v1389_v32  ;;  %v865_v47 = vsub.f32 %v2569_v29, %v813_v6  ;;  %v944_v29 = vmul.f32 %v928_v27, %v880_v50 }
 0x1ef   : > { %1808 = vlog2.f32 %v1279_v38  ;;  %v1155_v49 = vsub.s32 1, %v1139_v52  ;;  %v1302_v37 = vmul.f32 0.6931472, %v1807_v28  ;;  %v1199_v42 = vmax.f32 %v2480_v3, 0.0  ;;  %v814_v3 = vld [vmem:[%s1951_s18 + $0x58] sm:$0xff] }
 0x1f0   : > { %v1217_v4 = vand.u32 2147483647, %v2579_v39  ;;  %1810 = vpow2.f32 %v1257_v16  ;;  %v1471_v48 = vadd.f32 %v1470_v21, %v1469_v51  ;;  %vm2664_vm7 = vcmp.lt.f32.partialorder %v896_v34, 0.11111111 }
 0x1f1   : > { %v1393_v35 = vadd.f32 %v1392_v33, %v1391_v58  ;;  %v2671_v59 = vadd.f32 %v998_v11, %v997_v9  ;;  %v1394_v50 = vsel %vm534_vm3, %v1373_v24, 0.0  ;;  %v1472_v1 = vsel %vm534_vm3, %v1726_v2, 0.0  ;;  %v815_v9 = vld [vmem:[%s1951_s18 + $0x60] sm:$0xff] }
 0x1f2   : > { %v1233_v26 = vsub.f32 0.0, %v1217_v4  ;;  %v881_v4 = vsel %vm849_vm0, %v865_v47, 0.0  ;;  %vm1345_vm10 = vcmp.ne.s32.totalorder %v2520_v22, 4294967295  ;;  %v976_v54 = vsel %vm2664_vm7, %v944_v29, %v1694_v36  ;;  %v2709_v47 = vld [vmem:[%s1956_s21 + $0x70] sm:$0xff] }
 0x1f3   : > { %v770_v18 = vpop.f32.mrf.mxu2  ;;  %vm834_vm8 = vcmp.gt.s32.totalorder %v2582_v43, 0  ;;  %v1171_v5 = vcvt.s32.f32 %v1155_v49  ;;  %v1140_v38 = vmul.u32 2, %v2669_v57  ;;  %v1326_v13 = vadd.f32 %v1302_v37, %v1198_v46  ;;  %vm2688_vm12 = vmand %vm1345_vm10, %vm2148_vm11 }
 0x1f4   : > { %v2611_v61 = vadd.f32 %v2114_v31, %v770_v18  ;;  %v1259_v56 = vmul.f32 1.442695, %v1233_v26  ;;  %v1200_v53 = vmax.f32 %v2555_v8, 0.0  ;;  %v897_v16 = vand.u32 2147483647, %v881_v4  ;;  %vm850_vm13 = vmand %vm834_vm8, %vm819_vm4 }
 0x1f5   : > { %v1809_v18 = vpop.eup %1808  ;;  %v2684_v34 = vadd.f32 %v1472_v1, %v1471_v48  ;;  %v1395_v46 = vadd.f32 %v1394_v50, %v1393_v35  ;;  %v2695_v52 = vsel %vm534_vm3, %v976_v54, 0.0  ;;  %v1727_v28 = vsel %vm2688_vm12, 1.0, %v1880_v7  ;;  %v816_v1 = vld [vmem:[%s1951_s18 + $0x68] sm:$0xff] }
 0x1f6   : > { %v2635_v62 = vmul.f32 %v1170_v19, %v2611_v61  ;;  %1812 = vpow2.f32 %v1259_v56  ;;  %v1811_v51 = vpop.eup %1810  ;;  %v929_v19 = vmul.f32 4.5, %v881_v4  ;;  %v866_v26 = vsub.f32 %v2611_v61, %v814_v3 }
 0x1f7   : > { %v1304_v27 = vmul.f32 0.6931472, %v1809_v18  ;;  %v1280_v58 = vadd.f32 1.0, %v1811_v51  ;;  %vm835_vm2 = vcmp.gt.s32.totalorder %v2619_v14, 0  ;;  %v1156_v21 = vsub.s32 1, %v1140_v38 }
 0x1f8   : > { %v1218_v32 = vand.u32 2147483647, %v2635_v62  ;;  %v1374_v33 = vsel %vm2530_vm1, %v1326_v13, 0.0  ;;  %vm2713_vm5 = vcmp.lt.f32.partialorder %v897_v16, 0.11111111  ;;  %v2717_v2 = vmul.f32 %v929_v19, %v881_v4  ;;  %vm2727_vm1 = vmand %vm835_vm2, %vm819_vm4 }
 0x1f9   : > { %v2719_v56 = vadd.f32 -0.055555556, %v897_v16  ;;  %v882_v24 = vsel %vm850_vm13, %v866_v26, 0.0  ;;  %v1327_v49 = vadd.f32 %v1304_v27, %v1199_v42  ;;  %vm1346_vm15 = vcmp.ne.s32.totalorder %v2582_v43, 4294967295 }
 0x1fa   : > { %v1234_v63 = vsub.f32 0.0, %v1218_v32  ;;  %v1141_v37 = vmul.u32 2, %v2709_v47  ;;  %v1396_v48 = vsel %vm534_vm3, %v1374_v33, 0.0  ;;  %v1172_v4 = vcvt.s32.f32 %v1156_v21  ;;  %vm2747_vm0 = vmand %vm1346_vm15, %vm2148_vm11 }
 0x1fb   : > { %v1201_v42 = vmax.f32 %v2579_v39, 0.0  ;;  %v898_v18 = vand.u32 2147483647, %v882_v24  ;;  %vm836_vm14 = vcmp.gt.s32.totalorder %v2669_v57, 0  ;;  %v977_v3 = vsel %vm2713_vm5, %v2717_v2, %v2719_v56 }
 0x1fc   : > { %v1261_v12 = vmul.f32 1.442695, %v1234_v63  ;;  %v1813_v32 = vpop.eup %1812  ;;  %v2735_v63 = vsel %vm534_vm3, %v1727_v28, 0.0  ;;  %v930_v51 = vmul.f32 4.5, %v882_v24  ;;  %v1397_v13 = vadd.f32 %v1396_v48, %v1395_v46  ;;  %vm852_vm7 = vmand %vm836_vm14, %vm819_vm4 }
 0x1fd   : > { %v1281_v55 = vadd.f32 1.0, %v1813_v32  ;;  %v1375_v16 = vsel %vm2606_vm9, %v1327_v49, 0.0  ;;  %v2759_v19 = vsel %vm2747_vm0, 1.0, %v1880_v7  ;;  %vm2768_vm10 = vcmp.lt.f32.partialorder %v898_v18, 0.11111111 }
 0x1fe   : > { %1814 = vpow2.f32 %v1261_v12  ;;  %v1398_v21 = vsel %vm534_vm3, %v1375_v16, 0.0  ;;  %v946_v32 = vmul.f32 %v930_v51, %v882_v24  ;;  %v1696_v33 = vadd.f32 -0.055555556, %v898_v18 }
 0x1ff   : > { %1816 = vlog2.f32 %v1280_v58  ;;  %v1202_v58 = vmax.f32 %v2635_v62, 0.0  ;;  %vm837_vm9 = vcmp.gt.s32.totalorder %v2709_v47, 0  ;;  %vm1032_vm2 = vcmp.ge.s32.totalorder %v2487_v10, 0 }
 0x200   : > { %1818 = vlog2.f32 %v1281_v55  ;;  %vm2791_vm13 = vmand %vm837_vm9, %vm819_vm4  ;;  %vm1033_vm5 = vcmp.ge.s32.totalorder %v2520_v22, 0  ;;  %v1476_v10 = vsel %vm534_vm3, %v2759_v19, 0.0 }
 0x201   : > { %v773_v17 = vpop.f32.mrf.mxu3  ;;  %vm2865_vm9 = vmand %vm1033_vm5, %vm2148_vm11 }
 0x202   : > { %v774_v25 = vadd.f32 %v2114_v31, %v773_v17  ;;  %v1157_v17 = vsub.s32 1, %v1141_v37  ;;  %v2777_v37 = vadd.f32 %v1398_v21, %v1397_v13 }
 0x204   : > { %v2706_v61 = vmul.f32 %v1171_v5, %v774_v25  ;;  %v867_v29 = vsub.f32 %v774_v25, %v815_v9  ;;  %v1815_v26 = vpop.eup %1814  ;;  %v1173_v23 = vcvt.s32.f32 %v1157_v17  ;;  %v978_v17 = vsel %vm2768_vm10, %v946_v32, %v1696_v33 }
 0x205   : > { %v1817_v46 = vpop.eup %1816  ;;  %v1282_v2 = vadd.f32 1.0, %v1815_v26  ;;  %v1002_v26 = vsel %vm534_vm3, %v977_v3, 0.0  ;;  %v1001_v3 = vadd.f32 %v2695_v52, %v2671_v59  ;;  %vm1035_vm10 = vcmp.ge.s32.totalorder %v2619_v14, 0 }
 0x206   : > { %v1219_v36 = vand.u32 2147483647, %v2706_v61  ;;  %v883_v5 = vsel %vm2727_vm1, %v867_v29, 0.0  ;;  %v1819_v18 = vpop.eup %1818  ;;  %vm1051_vm5 = vmand %vm1035_vm10, %vm2148_vm11  ;;  %vm1349_vm10 = vcmp.ne.s32.totalorder %v2709_v47, 4294967295 }
 0x207   : > { %v899_v9 = vand.u32 2147483647, %v883_v5  ;;  %v931_v28 = vmul.f32 4.5, %v883_v5 }
 0x208   : > { %v1235_v35 = vsub.f32 0.0, %v1219_v36  ;;  %v1306_v36 = vmul.f32 0.6931472, %v1817_v46 }
 0x209   : > { %v776_v50 = vpop.f32.mrf.mxu3  ;;  %vm2779_vm8 = vcmp.lt.f32.partialorder %v899_v9, 0.11111111  ;;  %v947_v24 = vmul.f32 %v931_v28, %v883_v5  ;;  %v1697_v55 = vadd.f32 -0.055555556, %v899_v9  ;;  %v1308_v9 = vmul.f32 0.6931472, %v1819_v18 }
 0x20a   : > { %v777_v38 = vadd.f32 %v2114_v31, %v776_v50  ;;  %v1263_v12 = vmul.f32 1.442695, %v1235_v35  ;;  %v2766_v31 = vld [vmem:[%s1956_s21 + $0x78] sm:$0xff] }
 0x20b   : > { %v1142_v29 = vmul.u32 2, %v2766_v31  ;;  %vm838_vm15 = vcmp.gt.s32.totalorder %v2766_v31, 0  ;;  %v979_v0 = vsel %vm2779_vm8, %v947_v24, %v1697_v55  ;;  %v818_v55 = vld [vmem:[%s1951_s18 + $0x78] sm:$0xff]  ;;  %v2830_v13 = vadd.f32 %v1308_v9, %v1201_v42 }
 0x20c   : > { %v868_v25 = vsub.f32 %v777_v38, %v816_v1  ;;  %v2763_v27 = vmul.f32 %v1172_v4, %v777_v38  ;;  %1820 = vpow2.f32 %v1263_v12  ;;  %v817_v4 = vld [vmem:[%s1951_s18 + $0x70] sm:$0xff]  ;;  %v1838_v38 = vld [vmem:[%s3021_s6] ss:$0 sm:$0xff]  ;;  %v1328_v12 = vadd.f32 %v1306_v36, %v1200_v53 }
 0x20d   : > { %1822 = vlog2.f32 %v1282_v2  ;;  %v1158_v5 = vsub.s32 1, %v1142_v29  ;;  %v1003_v29 = vadd.f32 %v1002_v26, %v1001_v3  ;;  %v1101_v3 = vadd.f32 %v2559_v15, %v2574_v30 }
 0x20e   : > { %v1220_v11 = vand.u32 2147483647, %v2763_v27  ;;  %v884_v56 = vsel %vm852_vm7, %v868_v25, 0.0  ;;  %v1376_v36 = vsel %vm2646_vm6, %v1328_v12, 0.0  ;;  %vm854_vm6 = vmand %vm838_vm15, %vm819_vm4  ;;  %vm1034_vm7 = vcmp.ge.s32.totalorder %v2582_v43, 0 }
 0x20f   : > { %v900_v50 = vand.u32 2147483647, %v884_v56  ;;  %v932_v1 = vmul.f32 4.5, %v884_v56  ;;  %v1174_v52 = vcvt.s32.f32 %v1158_v5  ;;  %vm2849_vm4 = vmand %vm1032_vm2, %vm2148_vm11  ;;  %vm1036_vm2 = vcmp.ge.s32.totalorder %v2669_v57, 0 }
 0x210   : > { %v1236_v49 = vsub.f32 0.0, %v1220_v11  ;;  %v1710_v22 = vsel %vm2849_vm4, 1.0, %v1880_v7  ;;  %v1711_v43 = vsel %vm2865_vm9, 1.0, %v1880_v7  ;;  %vm1037_vm15 = vcmp.ge.s32.totalorder %v2709_v47, 0 }
 0x211   : > { %v779_v35 = vpop.f32.mrf.mxu3  ;;  %v948_v21 = vmul.f32 %v932_v1, %v884_v56  ;;  %v1698_v8 = vadd.f32 -0.055555556, %v900_v50  ;;  %vm2812_vm1 = vcmp.lt.f32.partialorder %v900_v50, 0.11111111  ;;  %v1004_v56 = vsel %vm534_vm3, %v978_v17, 0.0 }
 0x212   : > { %v1265_v51 = vmul.f32 1.442695, %v1236_v49  ;;  %v780_v16 = vadd.f32 %v1838_v38, %v779_v35  ;;  %v1821_v28 = vpop.eup %1820 }
 0x213   : > { %v1823_v49 = vpop.eup %1822  ;;  %v980_v44 = vsel %vm2812_vm1, %v948_v21, %v1698_v8  ;;  %vm1038_vm1 = vcmp.ge.s32.totalorder %v2766_v31, 0 }
 0x214   : > { %1824 = vpow2.f32 %v1265_v51  ;;  %v869_v25 = vsub.f32 %v780_v16, %v817_v4  ;;  %v2801_v46 = vmul.f32 %v1173_v23, %v780_v16  ;;  %v1283_v23 = vadd.f32 1.0, %v1821_v28  ;;  %vm2920_vm4 = vmand %vm1038_vm1, %vm2148_vm11 }
 0x215   : > { %v1006_v4 = vsel %vm534_vm3, %v979_v0, 0.0  ;;  %v1400_v16 = vsel %vm534_vm3, %v1376_v36, 0.0  ;;  %v1310_v17 = vmul.f32 0.6931472, %v1823_v49  ;;  %v1008_v39 = vsel %vm534_vm3, %v980_v44, 0.0 }
 0x216   : > { %v885_v53 = vsel %vm2791_vm13, %v869_v25, 0.0  ;;  %v1221_v32 = vand.u32 2147483647, %v2801_v46  ;;  %vm1050_vm13 = vmand %vm1034_vm7, %vm2148_vm11  ;;  %v1401_v51 = vadd.f32 %v1400_v16, %v2777_v37  ;;  %v1377_v44 = vsel %vm2688_vm12, %v2830_v13, 0.0 }
 0x217   : > { %v901_v33 = vand.u32 2147483647, %v885_v53  ;;  %v933_v11 = vmul.f32 4.5, %v885_v53  ;;  %vm1347_vm7 = vcmp.ne.s32.totalorder %v2619_v14, 4294967295  ;;  %v1204_v13 = vmax.f32 %v2763_v27, 0.0 }
 0x218   : > { %v1237_v59 = vsub.f32 0.0, %v1221_v32  ;;  %v2857_v32 = vadd.f32 %v1310_v17, %v1202_v58  ;;  %vm1348_vm12 = vcmp.ne.s32.totalorder %v2669_v57, 4294967295  ;;  %v1716_v27 = vsel %vm2920_vm4, 1.0, %v1880_v7 }
 0x219   : > { %v949_v48 = vmul.f32 %v933_v11, %v885_v53  ;;  %v782_v24 = vpop.f32.mrf.mxu3  ;;  %v1699_v35 = vadd.f32 -0.055555556, %v901_v33  ;;  %vm2821_vm14 = vcmp.lt.f32.partialorder %v901_v33, 0.11111111  ;;  %v1102_v53 = vsel %vm534_vm3, %v2639_v20, 0.0  ;;  %vm2955_vm9 = vmand %vm1348_vm12, %vm2148_vm11 }
 0x21a   : > { %v1825_v18 = vpop.eup %1824  ;;  %v1267_v50 = vmul.f32 1.442695, %v1237_v59  ;;  %v783_v1 = vadd.f32 %v1838_v38, %v782_v24  ;;  %v1005_v38 = vadd.f32 %v1004_v56, %v1003_v29  ;;  %v1103_v29 = vadd.f32 %v1102_v53, %v1101_v3 }
 0x21b   : > { %v1284_v5 = vadd.f32 1.0, %v1825_v18  ;;  %v981_v25 = vsel %vm2821_vm14, %v949_v48, %v1699_v35  ;;  %vm2898_vm14 = vmand %vm1036_vm2, %vm2148_vm11  ;;  %v1104_v35 = vsel %vm534_vm3, %v1710_v22, 0.0  ;;  %v1713_v18 = vsel %vm1051_vm5, 1.0, %v1880_v7 }
 0x21c   : > { %1826 = vpow2.f32 %v1267_v50  ;;  %v870_v26 = vsub.f32 %v783_v1, %v818_v55  ;;  %v2836_v12 = vmul.f32 %v1174_v52, %v783_v1  ;;  %v1007_v0 = vadd.f32 %v1006_v4, %v1005_v38 }
 0x21d   : > { %1828 = vlog2.f32 %v1283_v23  ;;  %v1010_v15 = vsel %vm534_vm3, %v981_v25, 0.0  ;;  %v1712_v23 = vsel %vm1050_vm13, 1.0, %v1880_v7  ;;  %v1105_v50 = vadd.f32 %v1104_v35, %v1103_v29 }
 0x21e   : > { %v886_v42 = vsel %vm854_vm6, %v870_v26, 0.0  ;;  %v1222_v9 = vand.u32 2147483647, %v2836_v12  ;;  %1830 = vlog2.f32 %v1284_v5  ;;  %v1009_v58 = vadd.f32 %v1008_v39, %v1007_v0  ;;  %vm1053_vm6 = vmand %vm1037_vm15, %vm2148_vm11 }
 0x21f   : > { %v934_v21 = vmul.f32 4.5, %v886_v42  ;;  %v902_v8 = vand.u32 2147483647, %v886_v42  ;;  %v1106_v1 = vsel %vm534_vm3, %v1711_v43, 0.0  ;;  %v1203_v5 = vmax.f32 %v2706_v61, 0.0 }
 0x220   : > { %v1238_v33 = vsub.f32 0.0, %v1222_v9  ;;  %v1011_v56 = vadd.f32 %v1010_v15, %v1009_v58  ;;  %v1108_v38 = vsel %vm534_vm3, %v1712_v23, 0.0  ;;  %v1714_v61 = vsel %vm2898_vm14, 1.0, %v1880_v7 }
 0x221   : > { %vm2869_vm8 = vcmp.lt.f32.partialorder %v902_v8, 0.11111111  ;;  %v950_v62 = vmul.f32 %v934_v21, %v886_v42  ;;  %v1700_v20 = vadd.f32 -0.055555556, %v902_v8  ;;  %v1107_v37 = vadd.f32 %v1106_v1, %v1105_v50 }
 0x222   : > { %v1827_v11 = vpop.eup %1826  ;;  %v1269_v2 = vmul.f32 1.442695, %v1238_v33  ;;  %v1378_v16 = vsel %vm2747_vm0, %v2857_v32, 0.0  ;;  %v1110_v26 = vsel %vm534_vm3, %v1713_v18, 0.0  ;;  %v1205_v39 = vmax.f32 %v2801_v46, 0.0  ;;  %vm2940_vm0 = vmand %vm1347_vm7, %vm2148_vm11 }
 0x223   : > { %v1829_v36 = vpop.eup %1828  ;;  %v1285_v59 = vadd.f32 1.0, %v1827_v11  ;;  %v982_v52 = vsel %vm2869_vm8, %v950_v62, %v1700_v20  ;;  %v1715_v42 = vsel %vm1053_vm6, 1.0, %v1880_v7  ;;  %v1109_v9 = vadd.f32 %v1108_v38, %v1107_v37  ;;  %vm2971_vm8 = vmand %vm1349_vm10, %vm2148_vm11 }
 0x224   : > { %1832 = vpow2.f32 %v1269_v2  ;;  %v1012_v49 = vsel %vm534_vm3, %v982_v52, 0.0  ;;  %v1831_v48 = vpop.eup %1830  ;;  %v1312_v4 = vmul.f32 0.6931472, %v1829_v36  ;;  %v1112_v46 = vsel %vm534_vm3, %v1714_v61, 0.0 }
 0x225   : > { %1834 = vlog2.f32 %v1285_v59  ;;  %v1013_v24 = vadd.f32 %v1012_v49, %v1011_v56  ;;  %v1314_v17 = vmul.f32 0.6931472, %v1831_v48  ;;  %v1111_v53 = vadd.f32 %v1110_v26, %v1109_v9 }
 0x226   : > { %v1331_v0 = vadd.f32 %v1312_v4, %v1203_v5  ;;  %v1475_v32 = vadd.f32 %v2735_v63, %v2684_v34  ;;  %v1402_v33 = vsel %vm534_vm3, %v1377_v44, 0.0  ;;  %v1114_v15 = vsel %vm534_vm3, %v1715_v42, 0.0 }
 0x227   : > { %1014 = vadd.xlane.f32.xlu0 %v1013_v24  ;;  %v1332_v21 = vadd.f32 %v1314_v17, %v1204_v13  ;;  %v1113_v63 = vadd.f32 %v1112_v46, %v1111_v53  ;;  %v1729_v62 = vsel %vm2940_vm0, 1.0, %v1880_v7  ;;  %v1404_v20 = vsel %vm534_vm3, %v1378_v16, 0.0 }
 0x228   : > { %v1379_v34 = vsel %vm2940_vm0, %v1331_v0, 0.0  ;;  %v1116_v19 = vsel %vm534_vm3, %v1716_v27, 0.0  ;;  %v1403_v11 = vadd.f32 %v1402_v33, %v1401_v51  ;;  %v1477_v22 = vadd.f32 %v1476_v10, %v1475_v32 }
 0x229   : > { %v1380_v58 = vsel %vm2955_vm9, %v1332_v21, 0.0  ;;  %v1115_v2 = vadd.f32 %v1114_v15, %v1113_v63  ;;  %vm1350_vm13 = vcmp.ne.s32.totalorder %v2766_v31, 4294967295  ;;  %v1406_v29 = vsel %vm534_vm3, %v1379_v34, 0.0 }
 0x22a   : > { %v1833_v25 = vpop.eup %1832  ;;  %v1478_v47 = vsel %vm534_vm3, %v1729_v62, 0.0  ;;  %v1405_v59 = vadd.f32 %v1404_v20, %v1403_v11  ;;  %v1730_v56 = vsel %vm2955_vm9, 1.0, %v1880_v7  ;;  %v1408_v49 = vsel %vm534_vm3, %v1380_v58, 0.0  ;;  %vm1366_vm2 = vmand %vm1350_vm13, %vm2148_vm11 }
 0x22b   : > { %v1835_v3 = vpop.eup %1834  ;;  %v1286_v28 = vadd.f32 1.0, %v1833_v25  ;;  %v1117_v52 = vadd.f32 %v1116_v19, %v1115_v2  ;;  %v1206_v23 = vmax.f32 %v2836_v12, 0.0  ;;  %v1479_v24 = vadd.f32 %v1478_v47, %v1477_v22 }
 0x22c   : > { %v1316_v8 = vmul.f32 0.6931472, %v1835_v3  ;;  %v1407_v31 = vadd.f32 %v1406_v29, %v1405_v59  ;;  %v1480_v35 = vsel %vm534_vm3, %v1730_v56, 0.0  ;;  %v1731_v50 = vsel %vm2971_vm8, 1.0, %v1880_v7 }
 0x22d   : > { %1836 = vlog2.f32 %v1286_v28  ;;  %v1481_v12 = vadd.f32 %v1480_v35, %v1479_v24  ;;  %v1482_v5 = vsel %vm534_vm3, %v1731_v50, 0.0  ;;  %v1732_v60 = vsel %vm1366_vm2, 1.0, %v1880_v7 }
 0x22e   : > { %v1333_v30 = vadd.f32 %v1316_v8, %v1205_v39  ;;  %v1409_v18 = vadd.f32 %v1408_v49, %v1407_v31  ;;  %v1484_v6 = vsel %vm534_vm3, %v1732_v60, 0.0  ;;  %v1526_v20 = vrot.slane %v2068_v41, 4 }
 0x22f   : > { %1118 = vadd.xlane.f32.xlu0 %v1117_v52  ;;  %v1483_v17 = vadd.f32 %v1482_v5, %v1481_v12  ;;  %v1533_v22 = vshrl.u32 %v785_v40, 7  ;;  %vm1536_vm11 = vcmp.eq.s32.totalorder %v2129_v45, 2  ;;  %vm1535_vm5 = vcmp.eq.s32.totalorder %v2129_v45, 1 }
 0x230   : > { %v1381_v36 = vsel %vm2971_vm8, %v1333_v30, 0.0  ;;  %v1527_v19 = vadd.f32 %v1526_v20, %v2068_v41  ;;  %vm1534_vm15 = vcmp.eq.s32.totalorder %v2129_v45, 0  ;;  %vm1544_vm1 = vcmp.lt.s32.totalorder %v2129_v45, 4 }
 0x231   : > { %v1410_v55 = vsel %vm534_vm3, %v1381_v36, 0.0  ;;  %v1485_v61 = vadd.f32 %v1484_v6, %v1483_v17  ;;  %vm1547_vm14 = vcmp.eq.s32.totalorder %v1533_v22, 1  ;;  %vm1546_vm6 = vcmp.eq.s32.totalorder %v1533_v22, 0 }
 0x232   : > { %v1411_v51 = vadd.f32 %v1410_v55, %v1409_v18  ;;  %v1528_v58 = vrot.slane %v1527_v19, 2 }
 0x233   : > { %v1837_v43 = vpop.eup %1836 }
 0x234   : > { %v1318_v48 = vmul.f32 0.6931472, %v1837_v43  ;;  %v1529_v11 = vadd.f32 %v1528_v58, %v1527_v19  ;;  %v1550_v43 = vld [vmem:[#allocation2] sm:$0xff] }
 0x236   : > { %v1334_v4 = vadd.f32 %v1318_v48, %v1206_v23  ;;  %v1530_v2 = vrot.slane %v1529_v11, 1 }
 0x238   : > { %v1382_v1 = vsel %vm1366_vm2, %v1334_v4, 0.0  ;;  %v1531_v29 = vadd.f32 %v1530_v2, %v1529_v11 }
 0x239   : > { %v1412_v44 = vsel %vm534_vm3, %v1382_v1, 0.0 }
 0x23a   : > { %v1413_v38 = vadd.f32 %v1412_v44, %v1411_v51  ;;  %v1548_v23 = vsel %vm1547_vm14, %v1531_v29, 0.0 }
 0x23c   : > { %1414 = vadd.xlane.f32.xlu1 %v1413_v38 }
 0x244   : > { %1486 = vadd.xlane.f32.xlu1 %v1485_v61 }
 0x29a   : > { %v1015_v37 = vpop.xlane.xlu0 %1014 }
 0x29b   : > { %v1016_v16 = vrot.slane %v1015_v37, 4 }
 0x29d   : > { %v1017_v13 = vadd.f32 %v1016_v16, %v1015_v37 }
 0x29f   : > { %v1018_v26 = vrot.slane %v1017_v13, 2 }
 0x2a1   : > { %v1019_v25 = vadd.f32 %v1018_v26, %v1017_v13 }
 0x2a2   : > { %v1119_v42 = vpop.xlane.xlu0 %1118 }
 0x2a3   : > { %v1020_v0 = vrot.slane %v1019_v25, 1  ;;  %v1120_v9 = vrot.slane %v1119_v42, 4 }
 0x2a5   : > { %v1021_v39 = vadd.f32 %v1020_v0, %v1019_v25  ;;  %v1121_v3 = vadd.f32 %v1120_v9, %v1119_v42 }
 0x2a7   : > { %1746 = vpush %v1021_v39  ;;  %v1122_v28 = vrot.slane %v1121_v3, 2 }
 0x2a9   : > { %v1123_v54 = vadd.f32 %v1122_v28, %v1121_v3 }
 0x2ab   : > { %v1124_v46 = vrot.slane %v1123_v54, 1 }
 0x2ad   : > { %v1125_v8 = vadd.f32 %v1124_v46, %v1123_v54 }
 0x2af   : > { %v1415_v7 = vpop.xlane.xlu1 %1414  ;;  %1748 = vpush %v1125_v8 }
 0x2b0   : > { %v1416_v27 = vrot.slane %v1415_v7, 4 }
 0x2b2   : > { %v1417_v21 = vadd.f32 %v1416_v27, %v1415_v7 }
 0x2b4   : > { %v1418_v53 = vrot.slane %v1417_v21, 2 }
 0x2b6   : > { %v1419_v32 = vadd.f32 %v1418_v53, %v1417_v21 }
 0x2b7   : > { %v1487_v33 = vpop.xlane.xlu1 %1486 }
 0x2b8   : > { %v1488_v14 = vrot.slane %v1487_v33, 4  ;;  %v1420_v15 = vrot.slane %v1419_v32, 1 }
 0x2ba   : > { %v1489_v10 = vadd.f32 %v1488_v14, %v1487_v33  ;;  %v1421_v30 = vadd.f32 %v1420_v15, %v1419_v32 }
 0x2bc   : > { %v1490_v34 = vrot.slane %v1489_v10, 2  ;;  %1750 = vpush %v1421_v30 }
 0x2be   : > { %v1491_v63 = vadd.f32 %v1490_v34, %v1489_v10 }
 0x2c0   : > { %v1492_v62 = vrot.slane %v1491_v63, 1 }
 0x2c2   : > { %v1493_v57 = vadd.f32 %v1492_v62, %v1491_v63 }
 0x2c4   : > { %1752 = vpush %v1493_v57 }
 0x2d8   : > { %s1747_s18 = spop %1746 }
 0x2d9   : > { %v1542_v52 = vstv %s1747_s18 }
 0x2e0   : > { %s1749_s11 = spop %1748 }
 0x2e1   : > { %v1540_v41 = vstv %s1749_s11 }
 0x2ed   : > { %s1751_s12 = spop %1750 }
 0x2ee   : > { %v1537_v47 = vstv %s1751_s12 }
 0x2f5   : > { %s1753_s13 = spop %1752 }
 0x2f6   : > { %v1538_v36 = vstv %s1753_s13 }
 0x2f7   : > { %v1539_v59 = vsel %vm1536_vm11, %v1537_v47, %v1538_v36 }
 0x2f8   : > { %v1541_v56 = vsel %vm1535_vm5, %v1540_v41, %v1539_v59 }
 0x2f9   : > { %v1543_v40 = vsel %vm1534_vm15, %v1542_v52, %v1541_v56 }
 0x2fa   : > { %v1545_v49 = vsel %vm1544_vm1, %v1543_v40, 0.0 }
 0x2fb   : > { %v1549_v48 = vsel %vm1546_vm6, %v1545_v49, %v1548_v23 }
 0x2fc   : > { %v1551_v31 = vadd.f32 %v1550_v43, %v1549_v48 }
 0x2fe   : > { %1552 = vst.msk [vmem:[#allocation2] sm:$0xff] %vm534_vm3, %v1551_v31 }
 0x2ff   : > { %1755 = dma.vmem_to_hbm [thread:$0]  (%p1758_p5), %s1560_s15, 128, %s1562_s19, [#allocation3]  }
 0x300   : > { %1872 = dma.done.wait (%p1758_p5), [#allocation3], 128  }
 0x301   : > { %1874 = vsyncadd (%p1758_p5), [#allocation3], 4294967168 }
 0x302 PF: > { %s20_s30 = sadd.s32 1, %s1877_s30  }
 0x303   : > { %p17_p6 = scmp.ge.s32.totalorder %s20_s30, 4  }
 0x305   :  { %19 = sbr.rel (!%p17_p6) target bundleno = 1 (0x1), region = 93 }
 0x30a   :  { %1575 = vsyncpa [#allocation3], 1 }
 0x30b   :  { %1577 = vsyncpa [#allocation3 + $0x1], 1 }

</bundles_post_ra>
